<compile_context>
chip_gen: v6e
topology: v6e:2x2x1
jax: 0.10.0
libtpu: 0.0.40
codegen_flags: <defaults>
</compile_context>

<pallas_src>
import math

import jax
import jax.numpy as jnp
from jax.experimental import pallas as pl
from jax.experimental.pallas import tpu as pltpu


# ----- module hyper-parameters (small, consistent with the module's __init__) -----
SIZE = 64
STRIDE = 8
RESOLUTION = SIZE // STRIDE          # 8
DIM = RESOLUTION * RESOLUTION        # 64  (= int((size/stride)**2))
HEADS = 2
DIM_HEAD = 16
INNER = HEADS * DIM_HEAD             # 32
SCALE = DIM_HEAD ** (-0.5)
# project_out = not (heads == 1 and dim_head == dim) -> True, so to_out = Linear + Dropout(0)

B = 2       # batch
N = 8       # number of tokens (== output "channel" axis after the final view)
BN = B * N

HIGHEST = jax.lax.Precision.HIGHEST

# Packed parameter-slab row offsets.
_QKV_ROW = 0                 # rows [0, 64):   to_qkv weight (q-cols pre-scaled), padded to 128 lanes
_WOUT_ROW = DIM              # rows [64, 128): block-diagonal to_out weight (2*INNER, 2*DIM)
_BIAS_ROW = DIM + 2 * INNER  # row  [128]:     [b_out | b_out]
_PARAM_ROWS = _BIAS_ROW + 1  # 129


def _attention_kernel(xs_ref, params_ref, o_ref):
    # xs_ref:     (2*B*N, DIM)        rows [0:BN) = x1, rows [BN:2BN) = x2
    # params_ref: (129, 2*DIM)        packed static parameters (see offsets above)
    # o_ref:      (B*N, 2*DIM)        lanes [0:DIM) = out_x1, lanes [DIM:2*DIM) = out_x2
    xs = xs_ref[...].astype(jnp.float32)
    w_qkv = params_ref[_QKV_ROW:_QKV_ROW + DIM, :]            # (64, 128), lanes 96..127 zero
    w_out = params_ref[_WOUT_ROW:_WOUT_ROW + 2 * INNER, :]    # (64, 128)
    bias = params_ref[_BIAS_ROW:_BIAS_ROW + 1, :]             # (1, 128)

    # One fused QKV projection for both inputs and both batch elements.
    # q columns were pre-scaled by SCALE in the wrapper; lanes 96..127 are unused zeros.
    qkv = jnp.dot(xs, w_qkv, preferred_element_type=jnp.float32,
                  precision=HIGHEST)                           # (2*B*N, 128)

    head_outs = []
    for h in range(HEADS):                                     # static unroll over heads
        qo = h * DIM_HEAD
        ko = INNER + h * DIM_HEAD
        vo = 2 * INNER + h * DIM_HEAD

        q1h = qkv[:BN, qo:qo + DIM_HEAD].reshape(B, N, DIM_HEAD)
        k2h = qkv[BN:2 * BN, ko:ko + DIM_HEAD].reshape(B, N, DIM_HEAD)
        v1h = qkv[:BN, vo:vo + DIM_HEAD].reshape(B, N, DIM_HEAD)
        v2h = qkv[BN:2 * BN, vo:vo + DIM_HEAD].reshape(B, N, DIM_HEAD)

        # dots_x1 = (q_x1 * scale) . k_x2^T   (scale already folded into w_qkv q-columns)
        dots = jnp.einsum("bid,bjd->bij", q1h, k2h,
                          preferred_element_type=jnp.float32,
                          precision=HIGHEST)                    # (B, N, N)
        m = jnp.max(dots, axis=-1, keepdims=True)
        e = jnp.exp(dots - m)
        attn = e / jnp.sum(e, axis=-1, keepdims=True)           # exact softmax

        # Fused attention-apply for both branches (reference quirk: branch 2 reuses attn_x1):
        #   out_x1_h = attn @ v_x2_h ; out_x2_h = attn @ v_x1_h
        v_cat = jnp.concatenate([v2h, v1h], axis=-1)             # (B, N, 2*DIM_HEAD)
        out12 = jnp.einsum("bij,bjd->bid", attn, v_cat,
                           preferred_element_type=jnp.float32,
                           precision=HIGHEST)                    # (B, N, 2*DIM_HEAD)
        head_outs.append(out12.reshape(BN, 2 * DIM_HEAD))

    # Build the projection LHS in-register (no VMEM scratch round-trip), then a single
    # fused output projection for both branches & batches; lane-dense (16,128) store.
    proj_lhs = jnp.concatenate(head_outs, axis=-1)               # (B*N, 2*INNER)
    o_ref[...] = (jnp.dot(proj_lhs, w_out, preferred_element_type=jnp.float32,
                          precision=HIGHEST) + bias).astype(o_ref.dtype)


def _pack_params(w_qkv, w_out, b_out):
    """Pack all static parameters into one (129, 128) slab (free XLA-side plumbing)."""
    # Fold the softmax scale into the q columns, pad 96 -> 128 lanes.
    col_scale = jnp.concatenate(
        [jnp.full((1, INNER), SCALE, dtype=w_qkv.dtype),
         jnp.ones((1, 2 * INNER), dtype=w_qkv.dtype)], axis=-1)          # (1, 96)
    w_qkv_pad = jnp.pad(w_qkv * col_scale,
                        ((0, 0), (0, 2 * DIM - 3 * INNER)))               # (64, 128)

    # Permuted block-diagonal to_out weight so one (B*N, 2*INNER) @ (2*INNER, 2*DIM)
    # matmul yields [out_x1 @ W_out | out_x2 @ W_out].  Row layout matches the kernel's
    # in-register lane layout: head-major, branch (x1 then x2) within each head.
    wo_h = w_out.reshape(HEADS, DIM_HEAD, DIM)                            # (H, DH, DIM)
    z = jnp.zeros_like(wo_h)
    w_big = jnp.concatenate(
        [jnp.concatenate([wo_h, z], axis=-1),      # branch-1 rows of each head
         jnp.concatenate([z, wo_h], axis=-1)],     # branch-2 rows of each head
        axis=1,
    ).reshape(2 * INNER, 2 * DIM)                                         # (64, 128)

    b_big = jnp.concatenate([b_out, b_out], axis=-1)                      # (1, 128)
    return jnp.concatenate([w_qkv_pad, w_big, b_big], axis=0)             # (129, 128)


@jax.jit
def attention_forward(x1, x2, w_qkv, w_out, b_out):
    """x1, x2: (B, N, DIM) -> (out1, out2) each (B, N, RESOLUTION, RESOLUTION)."""
    b, n, d = x1.shape
    assert d == DIM and x2.shape == x1.shape and (b, n) == (B, N)

    # Stack both inputs / both batches into one lane-dense LHS for the QKV matmul.
    xs = jnp.concatenate([x1, x2], axis=0).reshape(2 * b * n, DIM)        # (32, 64)
    params = _pack_params(w_qkv, w_out, b_out)                            # (129, 128)
    # TODO(synk): in a real model, batch many attention instances into one pallas_call
    # via a leading "parallel" grid axis to amortize the per-call launch overhead.

    out = pl.pallas_call(
        _attention_kernel,
        out_shape=jax.ShapeDtypeStruct((b * n, 2 * DIM), x1.dtype),       # (16, 128) lane-dense
        in_specs=[
            pl.BlockSpec(memory_space=pltpu.MemorySpace.VMEM),            # stacked activations
            pl.BlockSpec(memory_space=pltpu.MemorySpace.VMEM),            # packed parameter slab
        ],
        out_specs=pl.BlockSpec(memory_space=pltpu.MemorySpace.VMEM),
    )(xs, params)

    o1 = out[:, :DIM].reshape(b, n, RESOLUTION, RESOLUTION)
    o2 = out[:, DIM:].reshape(b, n, RESOLUTION, RESOLUTION)
    return o1, o2


def _reference_forward(x1, x2, w_qkv, w_out, b_out):
    """Pure-JAX reference mirroring the PyTorch forward (including its quirk), f32-accurate."""
    def split_heads(t):  # (B, N, INNER) -> (B, H, N, D)
        bb, nn, _ = t.shape
        return jnp.transpose(t.reshape(bb, nn, HEADS, DIM_HEAD), (0, 2, 1, 3))

    qkv1 = jnp.dot(x1, w_qkv, precision=HIGHEST)
    qkv2 = jnp.dot(x2, w_qkv, precision=HIGHEST)
    q1, k1, v1 = map(split_heads, jnp.split(qkv1, 3, axis=-1))
    q2, k2, v2 = map(split_heads, jnp.split(qkv2, 3, axis=-1))

    dots1 = jnp.einsum("bhid,bhjd->bhij", q1, k2, precision=HIGHEST) * SCALE
    attn1 = jax.nn.softmax(dots1, axis=-1)
    out1 = jnp.einsum("bhij,bhjd->bhid", attn1, v2, precision=HIGHEST)
    out1 = jnp.transpose(out1, (0, 2, 1, 3)).reshape(B, N, INNER)
    out1 = jnp.dot(out1, w_out, precision=HIGHEST) + b_out[0]

    # reference bug (kept): attn_x2 = softmax(dots_x1)
    attn2 = attn1
    out2 = jnp.einsum("bhij,bhjd->bhid", attn2, v1, precision=HIGHEST)
    out2 = jnp.transpose(out2, (0, 2, 1, 3)).reshape(B, N, INNER)
    out2 = jnp.dot(out2, w_out, precision=HIGHEST) + b_out[0]

    return (out1.reshape(B, N, RESOLUTION, RESOLUTION),
            out2.reshape(B, N, RESOLUTION, RESOLUTION))


if __name__ == "__main__":
    key = jax.random.PRNGKey(0)
    k1, k2, k3, k4, k5 = jax.random.split(key, 5)

    x1 = jax.random.normal(k1, (B, N, DIM), dtype=jnp.float32)
    x2 = jax.random.normal(k2, (B, N, DIM), dtype=jnp.float32)

    # deterministic parameter init (stored as (in, out) so y = x @ W + b)
    w_qkv = (jax.random.normal(k3, (DIM, 3 * INNER), dtype=jnp.float32)
             * (1.0 / math.sqrt(DIM)))
    w_out = (jax.random.normal(k4, (INNER, DIM), dtype=jnp.float32)
             * (1.0 / math.sqrt(INNER)))
    b_out = jax.random.normal(k5, (1, DIM), dtype=jnp.float32) * 0.01

    o1, o2 = attention_forward(x1, x2, w_qkv, w_out, b_out)
    jax.block_until_ready((o1, o2))

    r1, r2 = _reference_forward(x1, x2, w_qkv, w_out, b_out)
    assert o1.shape == (B, N, RESOLUTION, RESOLUTION)
    assert o2.shape == (B, N, RESOLUTION, RESOLUTION)
    err1 = float(jnp.max(jnp.abs(o1 - r1)))
    err2 = float(jnp.max(jnp.abs(o2 - r2)))
    assert jnp.allclose(o1, r1, atol=1e-4, rtol=1e-4), f"branch-1 max abs err {err1}"
    assert jnp.allclose(o2, r2, atol=1e-4, rtol=1e-4), f"branch-2 max abs err {err2}"

    print("KERNEL_OK")
</pallas_src>

<mosaic_0001>
module attributes {stable_mosaic.version = 11 : i64} {
  func.func @_attention_kernel(%arg0: memref<32x64xf32, #tpu.memory_space<vmem>>, %arg1: memref<129x128xf32, #tpu.memory_space<vmem>>, %arg2: memref<16x128xf32, #tpu.memory_space<vmem>>) attributes {dimension_semantics = [], scalar_prefetch = 0 : i64, scratch_operands = 0 : i64, tpu.core_type = #tpu.core_type<tc>} {
    %c0 = arith.constant 0 : index
    %c0_0 = arith.constant 0 : index
    %0 = vector.load %arg0[%c0, %c0_0] : memref<32x64xf32, #tpu.memory_space<vmem>>, vector<32x64xf32>
    %c0_1 = arith.constant 0 : index
    %c0_2 = arith.constant 0 : index
    %1 = vector.load %arg1[%c0_1, %c0_2] : memref<129x128xf32, #tpu.memory_space<vmem>>, vector<64x128xf32>
    %c64 = arith.constant 64 : index
    %c0_3 = arith.constant 0 : index
    %2 = vector.load %arg1[%c64, %c0_3] : memref<129x128xf32, #tpu.memory_space<vmem>>, vector<64x128xf32>
    %c128 = arith.constant 128 : index
    %c0_4 = arith.constant 0 : index
    %3 = vector.load %arg1[%c128, %c0_4] : memref<129x128xf32, #tpu.memory_space<vmem>>, vector<1x128xf32>
    %cst = arith.constant dense<0.000000e+00> : vector<32x128xf32>
    %4 = tpu.matmul %0, %1, %cst {dimension_numbers = #tpu.dot_dimension_numbers<[1], [0], [0], [1], [0, 0, 1, 1], [], []>, precision = #tpu.contract_precision<fp32>} : vector<32x64xf32>, vector<64x128xf32>, vector<32x128xf32> -> vector<32x128xf32>
    %5 = vector.extract_strided_slice %4 {offsets = [0, 0], sizes = [16, 16], strides = [1, 1]} : vector<32x128xf32> to vector<16x16xf32>
    %6 = vector.shape_cast %5 : vector<16x16xf32> to vector<2x8x16xf32>
    %7 = vector.extract_strided_slice %4 {offsets = [16, 32], sizes = [16, 16], strides = [1, 1]} : vector<32x128xf32> to vector<16x16xf32>
    %8 = vector.shape_cast %7 : vector<16x16xf32> to vector<2x8x16xf32>
    %9 = vector.extract_strided_slice %4 {offsets = [0, 64], sizes = [16, 16], strides = [1, 1]} : vector<32x128xf32> to vector<16x16xf32>
    %10 = vector.shape_cast %9 : vector<16x16xf32> to vector<2x8x16xf32>
    %11 = vector.extract_strided_slice %4 {offsets = [16, 64], sizes = [16, 16], strides = [1, 1]} : vector<32x128xf32> to vector<16x16xf32>
    %12 = vector.shape_cast %11 : vector<16x16xf32> to vector<2x8x16xf32>
    "tpu.trace_start"() <{level = 10 : i32, message = "bid,bjd->bij"}> : () -> ()
    %cst_5 = arith.constant dense<0.000000e+00> : vector<2x8x8xf32>
    %13 = tpu.matmul %6, %8, %cst_5 {dimension_numbers = #tpu.dot_dimension_numbers<[2], [2], [1], [1], [0, 0, 0, 1, 1, 1], [0], [0]>, precision = #tpu.contract_precision<fp32>} : vector<2x8x16xf32>, vector<2x8x16xf32>, vector<2x8x8xf32> -> vector<2x8x8xf32>
    "tpu.trace_stop"() : () -> ()
    %cst_6 = arith.constant dense<0xFF800000> : vector<2x8xf32>
    %14 = vector.multi_reduction <maximumf>, %13, %cst_6 [2] : vector<2x8x8xf32> to vector<2x8xf32>
    %15 = vector.shape_cast %14 : vector<2x8xf32> to vector<2x8x1xf32>
    %16 = vector.broadcast %15 : vector<2x8x1xf32> to vector<2x8x8xf32>
    %17 = arith.subf %13, %16 : vector<2x8x8xf32>
    %18 = math.exp %17 : vector<2x8x8xf32>
    %cst_7 = arith.constant dense<0.000000e+00> : vector<2x8xf32>
    %19 = vector.multi_reduction <add>, %18, %cst_7 [2] : vector<2x8x8xf32> to vector<2x8xf32>
    %20 = vector.shape_cast %19 : vector<2x8xf32> to vector<2x8x1xf32>
    %21 = vector.broadcast %20 : vector<2x8x1xf32> to vector<2x8x8xf32>
    %22 = arith.divf %18, %21 : vector<2x8x8xf32>
    %23 = tpu.concatenate %12, %10 in 2 : vector<2x8x16xf32>, vector<2x8x16xf32> -> vector<2x8x32xf32>
    "tpu.trace_start"() <{level = 10 : i32, message = "bij,bjd->bid"}> : () -> ()
    %cst_8 = arith.constant dense<0.000000e+00> : vector<2x8x32xf32>
    %24 = tpu.matmul %22, %23, %cst_8 {dimension_numbers = #tpu.dot_dimension_numbers<[2], [1], [1], [2], [0, 0, 0, 1, 1, 2], [0], [0]>, precision = #tpu.contract_precision<fp32>} : vector<2x8x8xf32>, vector<2x8x32xf32>, vector<2x8x32xf32> -> vector<2x8x32xf32>
    "tpu.trace_stop"() : () -> ()
    %25 = vector.shape_cast %24 : vector<2x8x32xf32> to vector<16x32xf32>
    %26 = vector.extract_strided_slice %4 {offsets = [0, 16], sizes = [16, 16], strides = [1, 1]} : vector<32x128xf32> to vector<16x16xf32>
    %27 = vector.shape_cast %26 : vector<16x16xf32> to vector<2x8x16xf32>
    %28 = vector.extract_strided_slice %4 {offsets = [16, 48], sizes = [16, 16], strides = [1, 1]} : vector<32x128xf32> to vector<16x16xf32>
    %29 = vector.shape_cast %28 : vector<16x16xf32> to vector<2x8x16xf32>
    %30 = vector.extract_strided_slice %4 {offsets = [0, 80], sizes = [16, 16], strides = [1, 1]} : vector<32x128xf32> to vector<16x16xf32>
    %31 = vector.shape_cast %30 : vector<16x16xf32> to vector<2x8x16xf32>
    %32 = vector.extract_strided_slice %4 {offsets = [16, 80], sizes = [16, 16], strides = [1, 1]} : vector<32x128xf32> to vector<16x16xf32>
    %33 = vector.shape_cast %32 : vector<16x16xf32> to vector<2x8x16xf32>
    "tpu.trace_start"() <{level = 10 : i32, message = "bid,bjd->bij"}> : () -> ()
    %cst_9 = arith.constant dense<0.000000e+00> : vector<2x8x8xf32>
    %34 = tpu.matmul %27, %29, %cst_9 {dimension_numbers = #tpu.dot_dimension_numbers<[2], [2], [1], [1], [0, 0, 0, 1, 1, 1], [0], [0]>, precision = #tpu.contract_precision<fp32>} : vector<2x8x16xf32>, vector<2x8x16xf32>, vector<2x8x8xf32> -> vector<2x8x8xf32>
    "tpu.trace_stop"() : () -> ()
    %cst_10 = arith.constant dense<0xFF800000> : vector<2x8xf32>
    %35 = vector.multi_reduction <maximumf>, %34, %cst_10 [2] : vector<2x8x8xf32> to vector<2x8xf32>
    %36 = vector.shape_cast %35 : vector<2x8xf32> to vector<2x8x1xf32>
    %37 = vector.broadcast %36 : vector<2x8x1xf32> to vector<2x8x8xf32>
    %38 = arith.subf %34, %37 : vector<2x8x8xf32>
    %39 = math.exp %38 : vector<2x8x8xf32>
    %cst_11 = arith.constant dense<0.000000e+00> : vector<2x8xf32>
    %40 = vector.multi_reduction <add>, %39, %cst_11 [2] : vector<2x8x8xf32> to vector<2x8xf32>
    %41 = vector.shape_cast %40 : vector<2x8xf32> to vector<2x8x1xf32>
    %42 = vector.broadcast %41 : vector<2x8x1xf32> to vector<2x8x8xf32>
    %43 = arith.divf %39, %42 : vector<2x8x8xf32>
    %44 = tpu.concatenate %33, %31 in 2 : vector<2x8x16xf32>, vector<2x8x16xf32> -> vector<2x8x32xf32>
    "tpu.trace_start"() <{level = 10 : i32, message = "bij,bjd->bid"}> : () -> ()
    %cst_12 = arith.constant dense<0.000000e+00> : vector<2x8x32xf32>
    %45 = tpu.matmul %43, %44, %cst_12 {dimension_numbers = #tpu.dot_dimension_numbers<[2], [1], [1], [2], [0, 0, 0, 1, 1, 2], [0], [0]>, precision = #tpu.contract_precision<fp32>} : vector<2x8x8xf32>, vector<2x8x32xf32>, vector<2x8x32xf32> -> vector<2x8x32xf32>
    "tpu.trace_stop"() : () -> ()
    %46 = vector.shape_cast %45 : vector<2x8x32xf32> to vector<16x32xf32>
    %47 = tpu.concatenate %25, %46 in 1 : vector<16x32xf32>, vector<16x32xf32> -> vector<16x64xf32>
    %cst_13 = arith.constant dense<0.000000e+00> : vector<16x128xf32>
    %48 = tpu.matmul %47, %2, %cst_13 {dimension_numbers = #tpu.dot_dimension_numbers<[1], [0], [0], [1], [0, 0, 1, 1], [], []>, precision = #tpu.contract_precision<fp32>} : vector<16x64xf32>, vector<64x128xf32>, vector<16x128xf32> -> vector<16x128xf32>
    %49 = vector.broadcast %3 : vector<1x128xf32> to vector<16x128xf32>
    %50 = arith.addf %48, %49 : vector<16x128xf32>
    %c0_14 = arith.constant 0 : index
    %c0_15 = arith.constant 0 : index
    %51 = vector.load %arg2[%c0_14, %c0_15] : memref<16x128xf32, #tpu.memory_space<vmem>>, vector<16x128xf32>
    tpu.vector_store %arg2[%c0_14, %c0_15], %50 {strides = array<i32>} : memref<16x128xf32, #tpu.memory_space<vmem>>, vector<16x128xf32>,
    return
  }
}

</mosaic_0001>

<bundles_post_ra>
// kernel: attention_forward.1
= control target key start
LH: loop header
LB: loop body
LE: loop exit
PB: predicated region body
PF: predicated region fallthrough
CT: control target
= control target key end

     0   :  { %vm32_vm0 = vcmask 523264   ;;  %vm5744_vm1 = vmmov 0   ;;  %vm714_vm2 = vcmask 130048   ;;  %vm1620_vm3 = vcmask 64512   ;;  %s5746_s5 = smov 64   ;;  %s5747_s6 = smov 80   ;;  %s6489_s1 = inlined_call_operand.vmem [shape: f32[129,128], index: 1, kind: input, shape index: {}]   ;;  %s6490_s0 = inlined_call_operand.vmem [shape: f32[32,64], index: 0, kind: input, shape index: {}]   ;;  %s6491_s2 = inlined_call_operand.vmem [shape: f32[16,128], index: 2, kind: output, shape index: {}]  }
   0x1   :  { %v22_v0 = vld [vmem:[%s6489_s1 + $0x38] sm:$0xff]  ;;  %v21_v1 = vld [vmem:[%s6489_s1 + $0x30] sm:$0xff]  ;;  %v20_v2 = vld [vmem:[%s6489_s1 + $0x28] sm:$0xff]  ;;  %s5748_s7 = smov 112   ;;  %s5749_s8 = smov 48   ;;  %vm4405_vm4 = vcmask 261120  }
   0x2   :  { %v5775_v3 = vand.u32 4294901760, %v22_v0  ;;  %v5777_v4 = vand.u32 4294901760, %v21_v1  ;;  %v5779_v5 = vand.u32 4294901760, %v20_v2  ;;  %v19_v6 = vld [vmem:[%s6489_s1 + $0x20] sm:$0xff]  ;;  %v18_v7 = vld [vmem:[%s6489_s1 + $0x18] sm:$0xff]  ;;  %v17_v8 = vld [vmem:[%s6489_s1 + $0x10] sm:$0xff] }
   0x3   :  { %v5790_v9 = vand.u32 4294901760, %v19_v6  ;;  %v5792_v10 = vand.u32 4294901760, %v18_v7  ;;  %v5794_v11 = vand.u32 4294901760, %v17_v8  ;;  %v16_v12 = vld [vmem:[%s6489_s1 + $0x8] sm:$0xff]  ;;  %v15_v13 = vld [vmem:[%s6489_s1] sm:$0xff]  ;;  %v13_v37 = vld [vmem:[%s6490_s0 + $0x10] sm:$0xff] }
   0x4   :  { %v11_v14 = vld [vmem:[%s6490_s0] sm:$0xff]  ;;  %5233 = vmatprep.subr.mxu0 %v5775_v3  ;;  %v5807_v15 = vsub.f32 %v22_v0, %v5775_v3  ;;  %v5810_v16 = vsub.f32 %v21_v1, %v5777_v4  ;;  %v5812_v17 = vand.u32 4294901760, %v16_v12  ;;  %v5815_v18 = vsub.f32 %v20_v2, %v5779_v5  ;;  %v12_v19 = vld [vmem:[%s6490_s0 + $0x8] sm:$0xff]  ;;  %v14_v42 = vld [vmem:[%s6490_s0 + $0x18] sm:$0xff]  ;;  %s5745_s0 = smov 96   ;;  %s5750_s25 = smov 32  }
   0x5   :  { %5234 = vmatpush3.msra.mxu0 %v5775_v3  ;;  %v5821_v20 = vand.u32 4294901760, %v15_v13  ;;  %v5824_v21 = vsub.f32 %v19_v6, %v5790_v9  ;;  %v34_v22 = vsel %vm32_vm0, %v11_v14, 0  ;;  %v5828_v23 = vsub.f32 %v18_v7, %v5792_v10 }
   0x6   :  { %5235 = vmatprep.subr.mxu0 %v5777_v4  ;;  %v5832_v24 = vand.u32 4294901760, %v5807_v15  ;;  %v5835_v25 = vand.u32 4294901760, %v5810_v16  ;;  %v5838_v26 = vand.u32 4294901760, %v5815_v18  ;;  %v5840_v27 = vand.u32 4294901760, %v34_v22 }
   0x7   :  { %5236 = vmatpush3.msra.mxu0 %v5777_v4  ;;  %v5844_v28 = vand.u32 4294901760, %v5824_v21  ;;  %v5847_v29 = vand.u32 4294901760, %v5828_v23  ;;  %v37_v30 = vsel %vm32_vm0, %v12_v19, 0  ;;  %v5851_v31 = vsub.f32 %v17_v8, %v5794_v11 }
   0x8   :  { %5237 = vmatprep.subr.mxu0 %v5779_v5  ;;  %v178_v32 = vsub.f32 %v5807_v15, %v5832_v24  ;;  %v185_v33 = vsub.f32 %v5810_v16, %v5835_v25  ;;  %v192_v34 = vsub.f32 %v5815_v18, %v5838_v26  ;;  %v5861_v35 = vsub.f32 %v34_v22, %v5840_v27 }
   0x9   :  { %5238 = vmatpush3.msra.mxu0 %v5779_v5  ;;  %v5864_v36 = vand.u32 4294901760, %v37_v30  ;;  %5271 = vmatprep.mubr.f32.mxu1 %v5840_v27  ;;  %v199_v40 = vsub.f32 %v5824_v21, %v5844_v28  ;;  %v206_v44 = vsub.f32 %v5828_v23, %v5847_v29  ;;  %v5884_v46 = vand.u32 4294901760, %v5851_v31 }
   0xa   :  { %5239 = vmatprep.subr.mxu0 %v5790_v9  ;;  %v179_v38 = vand.u32 4294901760, %v178_v32  ;;  %v186_v39 = vand.u32 4294901760, %v185_v33  ;;  %v120_v41 = vand.u32 4294901760, %v5861_v35  ;;  %v193_v43 = vand.u32 4294901760, %v192_v34 }
   0xb   :  { %5240 = vmatpush3.msra.mxu0 %v5790_v9  ;;  %v5881_v45 = vsub.f32 %v37_v30, %v5864_v36  ;;  %v5891_v48 = vsub.f32 %v16_v12, %v5812_v17  ;;  %v5894_v49 = vsub.f32 %v15_v13, %v5821_v20  ;;  %v40_v50 = vsel %vm32_vm0, %v13_v37, 0 }
   0xc   :  { %5241 = vmatprep.subr.mxu0 %v5792_v10  ;;  %5255 = vmatprep.subr.mxu1 %v179_v38  ;;  %v121_v47 = vsub.f32 %v5861_v35, %v120_v41  ;;  %v5899_v52 = vand.u32 4294901760, %v40_v50  ;;  %v43_v53 = vsel %vm32_vm0, %v14_v42, 0  ;;  %v200_v54 = vand.u32 4294901760, %v199_v40 }
   0xd   :  { %5242 = vmatpush3.msra.mxu0 %v5792_v10  ;;  %5256 = vmatpush3.msra.mxu1 %v179_v38  ;;  %v130_v51 = vand.u32 4294901760, %v5881_v45  ;;  %v5904_v55 = vand.u32 4294901760, %v5891_v48  ;;  %v5906_v56 = vand.u32 4294901760, %v43_v53  ;;  %v213_v58 = vsub.f32 %v5851_v31, %v5884_v46 }
   0xe   :  { %5243 = vmatprep.subr.mxu0 %v5794_v11  ;;  %5257 = vmatprep.subr.mxu1 %v186_v39  ;;  %v5915_v59 = vand.u32 4294901760, %v5894_v49  ;;  %v122_v60 = vand.u32 4294901760, %v121_v47  ;;  %v207_v61 = vand.u32 4294901760, %v206_v44  ;;  %v5919_v62 = vsub.f32 %v40_v50, %v5899_v52 }
   0xf   :  { %5244 = vmatpush3.msra.mxu0 %v5794_v11  ;;  %5258 = vmatpush3.msra.mxu1 %v186_v39  ;;  %v131_v57 = vsub.f32 %v5881_v45, %v130_v51  ;;  %v220_v0 = vsub.f32 %v5891_v48, %v5904_v55  ;;  %v5926_v1 = vsub.f32 %v43_v53, %v5906_v56  ;;  %v214_v2 = vand.u32 4294901760, %v213_v58 }
  0x10   :  { %5245 = vmatprep.subr.mxu0 %v5812_v17  ;;  %5259 = vmatprep.subr.mxu1 %v193_v43  ;;  %v227_v6 = vsub.f32 %v5894_v49, %v5915_v59  ;;  %v140_v7 = vand.u32 4294901760, %v5919_v62  ;;  %v5743_v40 = vmov 0.0  }
  0x11   :  { %5246 = vmatpush3.msra.mxu0 %v5812_v17  ;;  %5260 = vmatpush3.msra.mxu1 %v193_v43  ;;  %v132_v63 = vand.u32 4294901760, %v131_v57  ;;  %v221_v8 = vand.u32 4294901760, %v220_v0  ;;  %v150_v12 = vand.u32 4294901760, %v5926_v1 }
  0x12   :  { %5247 = vmatprep.subr.mxu0 %v5821_v20  ;;  %5261 = vmatprep.subr.mxu1 %v200_v54  ;;  %v228_v13 = vand.u32 4294901760, %v227_v6  ;;  %v141_v14 = vsub.f32 %v5919_v62, %v140_v7 }
  0x13   :  { %5248 = vmatpush3.msra.mxu0 %v5821_v20  ;;  %5262 = vmatpush3.msra.mxu1 %v200_v54 }
  0x14   :  { %5249 = vmatprep.mubr.f32.mxu0 %v122_v60  ;;  %5263 = vmatprep.subr.mxu1 %v207_v61 }
  0x15   :  { %5277 = vmatprep.subr.mxu0 %v5807_v15  ;;  %5250 = vmatmul.mubr.f32.vlgmr.msra.gmra.mxu0 %v132_v63 }
  0x16   :  { %5264 = vmatpush3.msra.mxu1 %v207_v61  ;;  %5278 = vmatpush3.msra.mxu0 %v5807_v15  ;;  %v151_v15 = vsub.f32 %v5926_v1, %v150_v12 }
  0x17   :  { %5265 = vmatprep.subr.mxu1 %v214_v2  ;;  %5279 = vmatprep.subr.mxu0 %v5810_v16 }
  0x18   :  { %5266 = vmatpush3.msra.mxu1 %v214_v2  ;;  %5280 = vmatpush3.msra.mxu0 %v5810_v16  ;;  %v142_v16 = vand.u32 4294901760, %v141_v14 }
  0x19   :  { %5267 = vmatprep.subr.mxu1 %v221_v8  ;;  %5281 = vmatprep.subr.mxu0 %v5815_v18 }
  0x1a   :  { %5268 = vmatpush3.msra.mxu1 %v221_v8  ;;  %5282 = vmatpush3.msra.mxu0 %v5815_v18  ;;  %v152_v18 = vand.u32 4294901760, %v151_v15 }
  0x1b   :  { %5269 = vmatprep.subr.mxu1 %v228_v13  ;;  %5283 = vmatprep.subr.mxu0 %v5824_v21 }
  0x1c   :  { %5270 = vmatpush3.msra.mxu1 %v228_v13  ;;  %5284 = vmatpush3.msra.mxu0 %v5824_v21 }
  0x1d   :  { %5272 = vmatmul.mubr.f32.vlgmr.msra.gmra.mxu1 %v5864_v36  ;;  %5285 = vmatprep.subr.mxu0 %v5828_v23 }
  0x1e   :  { %5299 = vmatprep.subr.mxu1 %v5775_v3  ;;  %5286 = vmatpush3.msra.mxu0 %v5828_v23 }
  0x1f   :  { %5300 = vmatpush3.msra.mxu1 %v5775_v3  ;;  %5287 = vmatprep.subr.mxu0 %v5851_v31 }
  0x20   :  { %5301 = vmatprep.subr.mxu1 %v5777_v4  ;;  %5252 = vmatprep.mubr.f32.mxu0 %v142_v16 }
  0x21   :  { %5288 = vmatpush3.msra.mxu0 %v5851_v31  ;;  %5302 = vmatpush3.msra.mxu1 %v5777_v4 }
  0x22   :  { %5253 = vmatmul.mubr.f32.gmra.mxu0 %v152_v18  ;;  %5289 = vmatprep.subr.mxu0 %v5891_v48 }
  0x23   :  { %5303 = vmatprep.subr.mxu1 %v5779_v5  ;;  %5290 = vmatpush3.msra.mxu0 %v5891_v48 }
  0x24   :  { %5304 = vmatpush3.msra.mxu1 %v5779_v5  ;;  %5291 = vmatprep.subr.mxu0 %v5894_v49 }
  0x25   :  { %5305 = vmatprep.subr.mxu1 %v5790_v9  ;;  %5292 = vmatpush3.msra.mxu0 %v5894_v49 }
  0x26   :  { %5293 = vmatprep.mubr.f32.mxu0 %v5861_v35  ;;  %5306 = vmatpush3.msra.mxu1 %v5790_v9 }
  0x27   :  { %5274 = vmatprep.mubr.f32.mxu1 %v5899_v52  ;;  %5294 = vmatmul.mubr.f32.vlgmr.msra.gmra.mxu0 %v5881_v45 }
  0x28   :  { %5307 = vmatprep.subr.mxu1 %v5792_v10  ;;  %5321 = vmatprep.subr.mxu0 %v5832_v24 }
  0x29   :  { %5275 = vmatmul.mubr.f32.gmra.mxu1 %v5906_v56  ;;  %5322 = vmatpush3.msra.mxu0 %v5832_v24 }
  0x2a   :  { %5308 = vmatpush3.msra.mxu1 %v5792_v10  ;;  %5323 = vmatprep.subr.mxu0 %v5835_v25 }
  0x2b   :  { %5309 = vmatprep.subr.mxu1 %v5794_v11  ;;  %5296 = vmatprep.mubr.f32.mxu0 %v5919_v62 }
  0x2c   :  { %5310 = vmatpush3.msra.mxu1 %v5794_v11  ;;  %5324 = vmatpush3.msra.mxu0 %v5835_v25 }
  0x2d   :  { %5297 = vmatmul.mubr.f32.gmra.mxu0 %v5926_v1  ;;  %5311 = vmatprep.subr.mxu1 %v5812_v17 }
  0x2e   :  { %5325 = vmatprep.subr.mxu0 %v5838_v26  ;;  %5312 = vmatpush3.msra.mxu1 %v5812_v17 }
  0x2f   :  { %5326 = vmatpush3.msra.mxu0 %v5838_v26  ;;  %5313 = vmatprep.subr.mxu1 %v5821_v20 }
  0x30   :  { %5327 = vmatprep.subr.mxu0 %v5844_v28  ;;  %5314 = vmatpush3.msra.mxu1 %v5821_v20 }
  0x31   :  { %5315 = vmatprep.mubr.f32.mxu1 %v120_v41  ;;  %5328 = vmatpush3.msra.mxu0 %v5844_v28 }
  0x32   :  { %5316 = vmatmul.mubr.f32.vlgmr.msra.gmra.mxu1 %v130_v51  ;;  %5329 = vmatprep.subr.mxu0 %v5847_v29 }
  0x33   :  { %5343 = vmatprep.subr.mxu1 %v5775_v3  ;;  %5330 = vmatpush3.msra.mxu0 %v5847_v29 }
  0x34   :  { %5344 = vmatpush3.msra.mxu1 %v5775_v3  ;;  %5331 = vmatprep.subr.mxu0 %v5884_v46 }
  0x35   :  { %5345 = vmatprep.subr.mxu1 %v5777_v4  ;;  %5318 = vmatprep.mubr.f32.mxu1 %v140_v7 }
  0x36   :  { %5332 = vmatpush3.msra.mxu0 %v5884_v46  ;;  %5346 = vmatpush3.msra.mxu1 %v5777_v4 }
  0x37   :  { %5319 = vmatmul.mubr.f32.gmra.mxu1 %v150_v12  ;;  %5333 = vmatprep.subr.mxu0 %v5904_v55 }
  0x38   :  { %5347 = vmatprep.subr.mxu1 %v5779_v5  ;;  %5334 = vmatpush3.msra.mxu0 %v5904_v55 }
  0x39   :  { %5348 = vmatpush3.msra.mxu1 %v5779_v5  ;;  %5335 = vmatprep.subr.mxu0 %v5915_v59 }
  0x3a   :  { %5349 = vmatprep.subr.mxu1 %v5790_v9  ;;  %5336 = vmatpush3.msra.mxu0 %v5915_v59 }
  0x3b   :  { %5337 = vmatprep.mubr.f32.mxu0 %v5840_v27  ;;  %5350 = vmatpush3.msra.mxu1 %v5790_v9 }
  0x3c   :  { %5338 = vmatmul.mubr.f32.vlgmr.msra.gmra.mxu0 %v5864_v36  ;;  %5351 = vmatprep.subr.mxu1 %v5792_v10 }
  0x3d   :  { %5352 = vmatpush3.msra.mxu1 %v5792_v10  ;;  %5340 = vmatprep.mubr.f32.mxu0 %v5899_v52 }
  0x3e   :  { %5353 = vmatprep.subr.mxu1 %v5794_v11  ;;  %5359 = vmatprep.mubr.f32.mxu1 %v5840_v27 }
  0x3f   :  { %5354 = vmatpush3.msra.mxu1 %v5794_v11  ;;  %5365 = vmatprep.subr.mxu0 %v5743_v40 }
  0x40   :  { %5341 = vmatmul.mubr.f32.gmra.mxu0 %v5906_v56  ;;  %5355 = vmatprep.subr.mxu1 %v5812_v17 }
  0x41   :  { %5356 = vmatpush3.msra.mxu1 %v5812_v17  ;;  %5367 = vmatprep.mubr.msk.f32.mxu0 %vm5744_vm1, %v5743_v40 }
  0x42   :  { %5357 = vmatprep.subr.mxu1 %v5821_v20 }
  0x43   :  { %5358 = vmatpush3.msra.mxu1 %v5821_v20 }
  0x44   :  { %5360 = vmatmul.mubr.f32.vlgmr.msra.gmra.mxu1 %v5864_v36  ;;  %5370 = vmatprep.subr.mxu1 %v5743_v40 }
  0x45   :  { %5362 = vmatprep.mubr.f32.mxu1 %v5899_v52 }
  0x48   :  { %5363 = vmatmul.mubr.f32.gmra.mxu1 %v5906_v56 }
  0x49   :  { %5372 = vmatprep.mubr.msk.f32.mxu1 %vm5744_vm1, %v5743_v40 }
  0xd5   :  { %v5251_v3 = vpop.f32.mrf.mxu0 }
  0xd7   :  { %v124_v9 = vpop.f32.mrf.mxu0 }
  0xdd   :  { %v5273_v4 = vpop.f32.mrf.mxu1 }
  0xde   :  { %v272_v5 = vadd.f32 %v5273_v4, %v5251_v3 }
  0xdf   :  { %v265_v10 = vpop.f32.mrf.mxu1 }
  0xe0   :  { %v266_v11 = vadd.f32 %v265_v10, %v124_v9 }
  0xe2   :  { %v5254_v19 = vpop.f32.mrf.mxu0 }
  0xe4   :  { %v144_v21 = vpop.f32.mrf.mxu0 }
  0xe7   :  { %v5295_v22 = vpop.f32.mrf.mxu0 }
  0xe8   :  { %v379_v17 = vadd.f32 %v5295_v22, %v272_v5 }
  0xe9   :  { %v371_v23 = vpop.f32.mrf.mxu0  ;;  %v5276_v25 = vpop.f32.mrf.mxu1 }
  0xea   :  { %v372_v24 = vadd.f32 %v371_v23, %v266_v11  ;;  %v284_v42 = vadd.f32 %v5276_v25, %v5254_v19 }
  0xeb   :  { %v277_v20 = vpop.f32.mrf.mxu1 }
  0xec   :  { %v278_v37 = vadd.f32 %v277_v20, %v144_v21 }
  0xed   :  { %v5298_v30 = vpop.f32.mrf.mxu0 }
  0xee   :  { %v393_v50 = vadd.f32 %v5298_v30, %v284_v42 }
  0xef   :  { %v385_v31 = vpop.f32.mrf.mxu0 }
  0xf0   :  { %v386_v43 = vadd.f32 %v385_v31, %v278_v37 }
  0xf2   :  { %v5317_v26 = vpop.f32.mrf.mxu1 }
  0xf3   :  { %v482_v27 = vadd.f32 %v5317_v26, %v379_v17 }
  0xf4   :  { %v473_v28 = vpop.f32.mrf.mxu1 }
  0xf5   :  { %v474_v29 = vadd.f32 %v473_v28, %v372_v24 }
  0xf7   :  { %v5320_v34 = vpop.f32.mrf.mxu1 }
  0xf8   :  { %v498_v53 = vadd.f32 %v5320_v34, %v393_v50 }
  0xf9   :  { %v489_v38 = vpop.f32.mrf.mxu1 }
  0xfa   :  { %v490_v47 = vadd.f32 %v489_v38, %v386_v43 }
  0xfc   :  { %v5339_v32 = vpop.f32.mrf.mxu0 }
  0xfd   :  { %v599_v33 = vadd.f32 %v5339_v32, %v482_v27 }
  0xfe   :  { %v592_v35 = vpop.f32.mrf.mxu0 }
  0xff   :  { %v593_v36 = vadd.f32 %v592_v35, %v474_v29 }
 0x100   :  { %v5342_v39 = vpop.f32.mrf.mxu0 }
 0x101   :  { %v611_v55 = vadd.f32 %v5342_v39, %v498_v53 }
 0x102   :  { %v604_v45 = vpop.f32.mrf.mxu0 }
 0x103   :  { %v605_v51 = vadd.f32 %v604_v45, %v490_v47 }
 0x104   :  { %v5361_v41 = vpop.f32.mrf.mxu1 }
 0x105   :  { %v6028_v44 = vadd.f32 %v5361_v41, %v599_v33 }
 0x106   :  { %v689_v46 = vpop.f32.mrf.mxu1 }
 0x107   :  { %v6034_v48 = vadd.f32 %v689_v46, %v593_v36  ;;  %v1170_v61 = vsel %vm714_vm2, %v6028_v44, 0 }
 0x108   :  { %v5364_v49 = vpop.f32.mrf.mxu1  ;;  %v6046_v63 = vand.u32 4294901760, %v1170_v61 }
 0x109   :  { %v6039_v56 = vadd.f32 %v5364_v49, %v611_v55  ;;  %v716_v57 = vsel %vm714_vm2, %v6034_v48, 0 }
 0x10a   :  { %v701_v52 = vpop.f32.mrf.mxu1  ;;  %v786_v58 = vand.u32 4294901760, %v716_v57  ;;  %v1241_v8 = vsub.f32 %v1170_v61, %v6046_v63 }
 0x10b   :  { %v6036_v54 = vadd.f32 %v701_v52, %v605_v51 }
 0x10c   :  { %v787_v59 = vsub.f32 %v716_v57, %v786_v58  ;;  %v1242_v18 = vand.u32 4294901760, %v1241_v8 }
 0x10d   :  { %712 = vrot.lane.b32.xlu0 %v6036_v54, %s5745_s0 }
 0x10e   :  { %v788_v60 = vand.u32 4294901760, %v787_v59  ;;  %v1243_v5 = vsub.f32 %v1241_v8, %v1242_v18 }
 0x110   :  { %v789_v1 = vsub.f32 %v787_v59, %v788_v60  ;;  %v1244_v10 = vand.u32 4294901760, %v1243_v5 }
 0x111   :  { %1167 = vrot.lane.b32.xlu0 %v6039_v56, %s5745_s0 }
 0x112   :  { %v790_v13 = vand.u32 4294901760, %v789_v1 }
 0x17f   :  { %v713_v62 = vpop.permute.xlu0 %712 }
 0x180   :  { %v718_v0 = vsel %vm714_vm2, %v713_v62, 0 }
 0x181   :  { %v751_v2 = vand.u32 4294901760, %v718_v0 }
 0x183   :  { %v828_v6 = vsub.f32 %v718_v0, %v751_v2  ;;  %5366 = vmatpush3.xpose.msra.mxu0 %v751_v2  ;;  %v1168_v7 = vpop.permute.xlu0 %1167 }
 0x184   :  { %v1172_v12 = vsel %vm714_vm2, %v1168_v7, 0  ;;  %5375 = vmatprep.subr.mxu0 %v5743_v40 }
 0x185   :  { %v829_v14 = vand.u32 4294901760, %v828_v6  ;;  %v1205_v15 = vand.u32 4294901760, %v1172_v12 }
 0x186   :  { %5368 = vmatmul.mubr.f32.vlgmr.msra.gmra.mxu0 %v790_v13 }
 0x187   :  { %v830_v16 = vsub.f32 %v828_v6, %v829_v14  ;;  %5376 = vmatpush3.xpose.msra.mxu0 %v828_v6  ;;  %5377 = vmatprep.mubr.msk.f32.mxu0 %vm5744_vm1, %v5743_v40  ;;  %v1282_v4 = vsub.f32 %v1172_v12, %v1205_v15 }
 0x188   :  { %5385 = vmatprep.subr.mxu0 %v5743_v40 }
 0x189   :  { %v831_v3 = vand.u32 4294901760, %v830_v16  ;;  %v1283_v9 = vand.u32 4294901760, %v1282_v4 }
 0x18a   :  { %5378 = vmatmul.mubr.f32.vlgmr.msra.gmra.mxu0 %v787_v59 }
 0x18b   :  { %5371 = vmatpush3.xpose.msra.mxu1 %v831_v3  ;;  %5386 = vmatpush3.xpose.msra.mxu0 %v829_v14  ;;  %v1284_v11 = vsub.f32 %v1282_v4, %v1283_v9 }
 0x18c   :  { %5387 = vmatprep.mubr.msk.f32.mxu0 %vm5744_vm1, %v5743_v40  ;;  %5380 = vmatprep.subr.mxu1 %v5743_v40 }
 0x18d   :  { %5395 = vmatprep.subr.mxu0 %v5743_v40  ;;  %v1285_v19 = vand.u32 4294901760, %v1284_v11 }
 0x18e   :  { %5373 = vmatmul.mubr.f32.vlgmr.msra.gmra.mxu1 %v786_v58  ;;  %5388 = vmatmul.mubr.f32.vlgmr.msra.gmra.mxu0 %v786_v58 }
 0x18f   :  { %5381 = vmatpush3.xpose.msra.mxu1 %v751_v2  ;;  %5396 = vmatpush3.xpose.msra.mxu0 %v1205_v15 }
 0x190   :  { %5382 = vmatprep.mubr.msk.f32.mxu1 %vm5744_vm1, %v5743_v40  ;;  %5397 = vmatprep.mubr.msk.f32.mxu0 %vm5744_vm1, %v5743_v40 }
 0x191   :  { %5390 = vmatprep.subr.mxu1 %v5743_v40  ;;  %5405 = vmatprep.subr.mxu0 %v5743_v40 }
 0x192   :  { %5383 = vmatmul.mubr.f32.vlgmr.msra.gmra.mxu1 %v788_v60  ;;  %5398 = vmatmul.mubr.f32.vlgmr.msra.gmra.mxu0 %v1244_v10 }
 0x193   :  { %5391 = vmatpush3.xpose.msra.mxu1 %v751_v2  ;;  %5406 = vmatpush3.xpose.msra.mxu0 %v1282_v4 }
 0x194   :  { %5392 = vmatprep.mubr.msk.f32.mxu1 %vm5744_vm1, %v5743_v40  ;;  %5407 = vmatprep.mubr.msk.f32.mxu0 %vm5744_vm1, %v5743_v40 }
 0x195   :  { %5400 = vmatprep.subr.mxu1 %v5743_v40  ;;  %5415 = vmatprep.subr.mxu0 %v5743_v40 }
 0x196   :  { %5393 = vmatmul.mubr.f32.vlgmr.msra.gmra.mxu1 %v786_v58  ;;  %5408 = vmatmul.mubr.f32.vlgmr.msra.gmra.mxu0 %v1241_v8 }
 0x197   :  { %5401 = vmatpush3.xpose.msra.mxu1 %v1285_v19  ;;  %5416 = vmatpush3.xpose.msra.mxu0 %v1283_v9 }
 0x198   :  { %5402 = vmatprep.mubr.msk.f32.mxu1 %vm5744_vm1, %v5743_v40  ;;  %5417 = vmatprep.mubr.msk.f32.mxu0 %vm5744_vm1, %v5743_v40 }
 0x199   :  { %5410 = vmatprep.subr.mxu1 %v5743_v40  ;;  %5425 = vmatprep.subr.mxu0 %v5743_v40 }
 0x19a   :  { %5403 = vmatmul.mubr.f32.vlgmr.msra.gmra.mxu1 %v6046_v63  ;;  %5418 = vmatmul.mubr.f32.vlgmr.msra.gmra.mxu0 %v6046_v63 }
 0x19b   :  { %5411 = vmatpush3.xpose.msra.mxu1 %v1205_v15  ;;  %5412 = vmatprep.mubr.msk.f32.mxu1 %vm5744_vm1, %v5743_v40 }
 0x19c   :  { %5420 = vmatprep.subr.mxu1 %v5743_v40  ;;  %5427 = vmatprep.mubr.msk.f32.mxu0 %vm5744_vm1, %v5743_v40 }
 0x19e   :  { %5413 = vmatmul.mubr.f32.vlgmr.msra.gmra.mxu1 %v1242_v18 }
 0x19f   :  { %5421 = vmatpush3.xpose.msra.mxu1 %v1205_v15  ;;  %5422 = vmatprep.mubr.msk.f32.mxu1 %vm5744_vm1, %v5743_v40 }
 0x1a0   :  { %5430 = vmatprep.subr.mxu1 %v5743_v40 }
 0x1a2   :  { %5423 = vmatmul.mubr.f32.vlgmr.msra.gmra.mxu1 %v6046_v63 }
 0x1a3   :  { %5432 = vmatprep.mubr.msk.f32.mxu1 %vm5744_vm1, %v5743_v40 }
 0x246   :  { %v792_v21 = vpop.f32.mrf.mxu0 }
 0x248   :  { %v5369_v22 = vpop.f32.mrf.mxu0 }
 0x24a   :  { %v942_v17 = vpop.f32.mrf.mxu0 }
 0x24c   :  { %v5379_v23 = vpop.f32.mrf.mxu0 }
 0x24e   :  { %v868_v24 = vpop.f32.mrf.mxu1  ;;  %v1090_v25 = vpop.f32.mrf.mxu0 }
 0x24f   :  { %v869_v20 = vadd.f32 %v868_v24, %v792_v21 }
 0x250   :  { %v5374_v26 = vpop.f32.mrf.mxu1  ;;  %v5389_v27 = vpop.f32.mrf.mxu0 }
 0x251   :  { %v943_v28 = vadd.f32 %v942_v17, %v869_v20 }
 0x252   :  { %v1016_v29 = vpop.f32.mrf.mxu1  ;;  %v1246_v30 = vpop.f32.mrf.mxu0 }
 0x253   :  { %v1017_v31 = vadd.f32 %v1016_v29, %v943_v28 }
 0x254   :  { %v5384_v32 = vpop.f32.mrf.mxu1  ;;  %v5399_v33 = vpop.f32.mrf.mxu0 }
 0x255   :  { %v1091_v34 = vadd.f32 %v1090_v25, %v1017_v31 }
 0x256   :  { %v1162_v35 = vpop.f32.mrf.mxu1  ;;  %v1396_v36 = vpop.f32.mrf.mxu0 }
 0x257   :  { %v1163_v37 = vadd.f32 %v1162_v35, %v1091_v34 }
 0x258   :  { %v5394_v38 = vpop.f32.mrf.mxu1  ;;  %v5409_v39 = vpop.f32.mrf.mxu0 }
 0x259   :  { %v1621_v41 = vsel %vm1620_vm3, %v1163_v37, -inf }
 0x25a   :  { %1622 = vmax.xlane.f32.xlu1 %v1621_v41  ;;  %v1322_v42 = vpop.f32.mrf.mxu1  ;;  %v1544_v43 = vpop.f32.mrf.mxu0 }
 0x25b   :  { %v1323_v45 = vadd.f32 %v1322_v42, %v1246_v30 }
 0x25c   :  { %v5404_v46 = vpop.f32.mrf.mxu1  ;;  %v5419_v47 = vpop.f32.mrf.mxu0 }
 0x25d   :  { %v1397_v49 = vadd.f32 %v1396_v36, %v1323_v45 }
 0x25e   :  { %v1470_v50 = vpop.f32.mrf.mxu1 }
 0x25f   :  { %v1471_v51 = vadd.f32 %v1470_v50, %v1397_v49 }
 0x260   :  { %v5414_v52 = vpop.f32.mrf.mxu1 }
 0x261   :  { %v1545_v53 = vadd.f32 %v1544_v43, %v1471_v51 }
 0x262   :  { %v1616_v55 = vpop.f32.mrf.mxu1 }
 0x263   :  { %v1617_v57 = vadd.f32 %v1616_v55, %v1545_v53 }
 0x264   :  { %v5424_v58 = vpop.f32.mrf.mxu1 }
 0x265   :  { %v1624_v59 = vsel %vm1620_vm3, %v1617_v57, -inf }
 0x266   :  { %1625 = vmax.xlane.f32.xlu1 %v1624_v59 }
 0x277   :  { %1643 = vrot.lane.b32.xlu1 %v6036_v54, %s5746_s5 }
 0x27b   :  { %1649 = vrot.lane.b32.xlu1 %v6034_v48, %s5747_s6 }
 0x27f   :  { %1645 = vrot.lane.b32.xlu1 %v6039_v56, %s5746_s5 }
 0x2e3   :  { %v1623_v60 = vpop.xlane.xlu1 %1622 }
 0x2e4   :  { %v1627_v61 = vsub.f32 %v1163_v37, %v1623_v60 }
 0x2e6   :  { %v1629_v62 = vmul.f32 1.442695, %v1627_v61 }
 0x2e8   :  { %5727 = vpow2.f32 %v1629_v62 }
 0x2ef   :  { %v1626_v63 = vpop.xlane.xlu1 %1625 }
 0x2f0   :  { %v1628_v0 = vsub.f32 %v1617_v57, %v1626_v63 }
 0x2f2   :  { %v1631_v1 = vmul.f32 1.442695, %v1628_v0 }
 0x2f3   :  { %v1644_v2 = vpop.permute.xlu1 %1643 }
 0x2f4   :  { %5729 = vpow2.f32 %v1631_v1 }
 0x2f5   :  { %v5728_v6 = vpop.eup %5727 }
 0x2f6   :  { %v1633_v7 = vsel %vm1620_vm3, %v5728_v6, 0.0 }
 0x2f7   :  { %1634 = vadd.xlane.f32.xlu0 %v1633_v7  ;;  %v1650_v8 = vpop.permute.xlu1 %1649 }
 0x2f8   :  { %v1655_v12 = vsel %vm714_vm2, %v1644_v2, %v1650_v8 }
 0x2f9   :  { %v1691_v13 = vand.u32 4294901760, %v1655_v12 }
 0x2fb   :  { %v6100_v14 = vsub.f32 %v1655_v12, %v1691_v13  ;;  %5426 = vmatpush3.msra.mxu0 %v1691_v13  ;;  %v1646_v9 = vpop.permute.xlu1 %1645 }
 0x2fc   :  { %5435 = vmatprep.subr.mxu0 %v5743_v40 }
 0x2fd   :  { %v1769_v15 = vand.u32 4294901760, %v6100_v14 }
 0x2ff   :  { %v1770_v16 = vsub.f32 %v6100_v14, %v1769_v15 }
 0x301   :  { %v5730_v18 = vpop.eup %5729  ;;  %v1771_v3 = vand.u32 4294901760, %v1770_v16 }
 0x302   :  { %v1636_v4 = vsel %vm1620_vm3, %v5730_v18, 0.0 }
 0x303   :  { %1637 = vadd.xlane.f32.xlu1 %v1636_v4  ;;  %5431 = vmatpush3.msra.mxu1 %v1771_v3 }
 0x304   :  { %5440 = vmatprep.subr.mxu1 %v5743_v40 }
 0x30d   :  { %2557 = vrot.lane.b32.xlu0 %v6036_v54, %s5747_s6 }
 0x314   :  { %1651 = vrot.lane.b32.xlu1 %v6028_v44, %s5747_s6 }
 0x318   :  { %2555 = vrot.lane.b32.xlu1 %v6034_v48, %s5748_s7 }
 0x31c   :  { %3011 = vrot.lane.b32.xlu1 %v6039_v56, %s5747_s6 }
 0x320   :  { %3009 = vrot.lane.b32.xlu1 %v6028_v44, %s5748_s7 }
 0x380   :  { %v1635_v5 = vpop.xlane.xlu0 %1634 }
 0x381   :  { %5731 = vrcp.f32 %v1635_v5 }
 0x384   :  { %v2558_v22 = vpop.permute.xlu0 %2557 }
 0x385   :  { %v2561_v20 = vsel %vm714_vm2, %v2558_v22, 0 }
 0x386   :  { %v6126_v30 = vand.u32 4294901760, %v2561_v20 }
 0x388   :  { %v6135_v37 = vsub.f32 %v2561_v20, %v6126_v30 }
 0x38a   :  { %v2672_v43 = vand.u32 4294901760, %v6135_v37 }
 0x38c   :  { %v1638_v10 = vpop.xlane.xlu1 %1637  ;;  %v2673_v51 = vsub.f32 %v6135_v37, %v2672_v43 }
 0x38d   :  { %5733 = vrcp.f32 %v1638_v10 }
 0x38e   :  { %v5732_v11 = vpop.eup %5731  ;;  %v2674_v58 = vand.u32 4294901760, %v2673_v51 }
 0x38f   :  { %v1640_v19 = vmul.f32 %v5732_v11, %v5728_v6 }
 0x390   :  { %v1652_v21 = vpop.permute.xlu1 %1651 }
 0x391   :  { %v1656_v17 = vsel %vm714_vm2, %v1646_v9, %v1652_v21  ;;  %v1658_v23 = vsel %vm1620_vm3, %v1640_v19, 0 }
 0x392   :  { %v2140_v24 = vand.u32 4294901760, %v1656_v17  ;;  %v1726_v25 = vand.u32 4294901760, %v1658_v23 }
 0x394   :  { %v6120_v26 = vsub.f32 %v1656_v17, %v2140_v24  ;;  %v1727_v27 = vsub.f32 %v1658_v23, %v1726_v25  ;;  %5433 = vmatmul.mubr.f32.vlgmr.msra.gmra.mxu1 %v1726_v25  ;;  %v2556_v31 = vpop.permute.xlu1 %2555 }
 0x395   :  { %5441 = vmatpush3.msra.mxu1 %v1691_v13  ;;  %5442 = vmatprep.mubr.msk.f32.mxu1 %vm5744_vm1, %v5743_v40  ;;  %v2559_v45 = vsel %vm714_vm2, %v2556_v31, 0 }
 0x396   :  { %v2218_v28 = vand.u32 4294901760, %v6120_v26  ;;  %5450 = vmatprep.subr.mxu1 %v5743_v40  ;;  %v1728_v29 = vand.u32 4294901760, %v1727_v27  ;;  %v6150_v49 = vand.u32 4294901760, %v2559_v45 }
 0x398   :  { %v2219_v32 = vsub.f32 %v6120_v26, %v2218_v28  ;;  %5443 = vmatmul.mubr.f32.vlgmr.msra.gmra.mxu1 %v1728_v29  ;;  %v1729_v33 = vsub.f32 %v1727_v27, %v1728_v29  ;;  %v3012_v39 = vpop.permute.xlu1 %3011  ;;  %v2630_v55 = vsub.f32 %v2559_v45, %v6150_v49 }
 0x399   :  { %5451 = vmatpush3.msra.mxu1 %v1691_v13  ;;  %5452 = vmatprep.mubr.msk.f32.mxu1 %vm5744_vm1, %v5743_v40  ;;  %v3015_v46 = vsel %vm714_vm2, %v3012_v39, 0 }
 0x39a   :  { %v5734_v34 = vpop.eup %5733  ;;  %5460 = vmatprep.subr.mxu1 %v5743_v40  ;;  %v1730_v35 = vand.u32 4294901760, %v1729_v33  ;;  %v2220_v36 = vand.u32 4294901760, %v2219_v32  ;;  %v6158_v52 = vand.u32 4294901760, %v3015_v46  ;;  %v2631_v61 = vand.u32 4294901760, %v2630_v55 }
 0x39b   :  { %v1642_v38 = vmul.f32 %v5734_v34, %v5730_v18 }
 0x39c   :  { %5428 = vmatmul.mubr.f32.vlgmr.msra.gmra.mxu0 %v1730_v35  ;;  %5453 = vmatmul.mubr.f32.vlgmr.msra.gmra.mxu1 %v1726_v25  ;;  %v6168_v59 = vsub.f32 %v3015_v46, %v6158_v52  ;;  %v3010_v60 = vpop.permute.xlu1 %3009  ;;  %v2632_v0 = vsub.f32 %v2630_v55, %v2631_v61 }
 0x39d   :  { %5436 = vmatpush3.msra.mxu0 %v6100_v14  ;;  %5461 = vmatpush3.msra.mxu1 %v2220_v36  ;;  %v2107_v41 = vsel %vm1620_vm3, %v1642_v38, 0  ;;  %v3013_v63 = vsel %vm714_vm2, %v3010_v60, 0 }
 0x39e   :  { %5437 = vmatprep.mubr.msk.f32.mxu0 %vm5744_vm1, %v5743_v40  ;;  %5445 = vmatprep.subr.mxu0 %v5743_v40  ;;  %v2175_v42 = vand.u32 4294901760, %v2107_v41  ;;  %v3126_v62 = vand.u32 4294901760, %v6168_v59  ;;  %v3083_v1 = vand.u32 4294901760, %v3013_v63  ;;  %v2633_v6 = vand.u32 4294901760, %v2632_v0 }
 0x39f   :  { %5462 = vmatprep.mubr.msk.f32.mxu1 %vm5744_vm1, %v5743_v40  ;;  %5470 = vmatprep.subr.mxu1 %v5743_v40 }
 0x3a0   :  { %5438 = vmatmul.mubr.f32.vlgmr.msra.gmra.mxu0 %v1727_v27  ;;  %v2176_v47 = vsub.f32 %v2107_v41, %v2175_v42  ;;  %5463 = vmatmul.mubr.f32.vlgmr.msra.gmra.mxu1 %v2175_v42  ;;  %v3127_v2 = vsub.f32 %v6168_v59, %v3126_v62  ;;  %v3084_v7 = vsub.f32 %v3013_v63, %v3083_v1 }
 0x3a1   :  { %5446 = vmatpush3.msra.mxu0 %v1769_v15  ;;  %5471 = vmatpush3.msra.mxu1 %v2140_v24 }
 0x3a2   :  { %5447 = vmatprep.mubr.msk.f32.mxu0 %vm5744_vm1, %v5743_v40  ;;  %5455 = vmatprep.subr.mxu0 %v5743_v40  ;;  %v2177_v50 = vand.u32 4294901760, %v2176_v47  ;;  %v3128_v8 = vand.u32 4294901760, %v3127_v2  ;;  %v3085_v12 = vand.u32 4294901760, %v3084_v7 }
 0x3a3   :  { %5472 = vmatprep.mubr.msk.f32.mxu1 %vm5744_vm1, %v5743_v40  ;;  %5480 = vmatprep.subr.mxu1 %v5743_v40 }
 0x3a4   :  { %5448 = vmatmul.mubr.f32.vlgmr.msra.gmra.mxu0 %v1726_v25  ;;  %5473 = vmatmul.mubr.f32.vlgmr.msra.gmra.mxu1 %v2177_v50  ;;  %v2178_v53 = vsub.f32 %v2176_v47, %v2177_v50  ;;  %v3086_v13 = vsub.f32 %v3084_v7, %v3085_v12 }
 0x3a5   :  { %5456 = vmatpush3.msra.mxu0 %v2140_v24  ;;  %5481 = vmatpush3.msra.mxu1 %v2140_v24 }
 0x3a6   :  { %5457 = vmatprep.mubr.msk.f32.mxu0 %vm5744_vm1, %v5743_v40  ;;  %5465 = vmatprep.subr.mxu0 %v5743_v40  ;;  %v2179_v57 = vand.u32 4294901760, %v2178_v53  ;;  %v3087_v14 = vand.u32 4294901760, %v3086_v13 }
 0x3a7   :  { %5482 = vmatprep.mubr.msk.f32.mxu1 %vm5744_vm1, %v5743_v40  ;;  %5490 = vmatprep.subr.mxu1 %v5743_v40 }
 0x3a8   :  { %5458 = vmatmul.mubr.f32.vlgmr.msra.gmra.mxu0 %v2179_v57  ;;  %5483 = vmatmul.mubr.f32.vlgmr.msra.gmra.mxu1 %v2175_v42 }
 0x3a9   :  { %5466 = vmatpush3.msra.mxu0 %v6120_v26  ;;  %5491 = vmatpush3.xpose.msra.mxu1 %v2674_v58 }
 0x3aa   :  { %5467 = vmatprep.mubr.msk.f32.mxu0 %vm5744_vm1, %v5743_v40  ;;  %5475 = vmatprep.subr.mxu0 %v5743_v40 }
 0x3ab   :  { %5492 = vmatprep.mubr.msk.f32.mxu1 %vm5744_vm1, %v5743_v40  ;;  %5500 = vmatprep.subr.mxu1 %v5743_v40 }
 0x3ac   :  { %5468 = vmatmul.mubr.f32.vlgmr.msra.gmra.mxu0 %v2176_v47  ;;  %5493 = vmatmul.mubr.f32.vlgmr.msra.gmra.mxu1 %v6150_v49 }
 0x3ad   :  { %5476 = vmatpush3.msra.mxu0 %v2218_v28  ;;  %5501 = vmatpush3.xpose.msra.mxu1 %v6126_v30 }
 0x3ae   :  { %5477 = vmatprep.mubr.msk.f32.mxu0 %vm5744_vm1, %v5743_v40  ;;  %5485 = vmatprep.subr.mxu0 %v5743_v40 }
 0x3af   :  { %5502 = vmatprep.mubr.msk.f32.mxu1 %vm5744_vm1, %v5743_v40  ;;  %5510 = vmatprep.subr.mxu1 %v5743_v40 }
 0x3b0   :  { %5478 = vmatmul.mubr.f32.vlgmr.msra.gmra.mxu0 %v2175_v42  ;;  %5503 = vmatmul.mubr.f32.vlgmr.msra.gmra.mxu1 %v2631_v61 }
 0x3b1   :  { %5486 = vmatpush3.xpose.msra.mxu0 %v6126_v30  ;;  %5511 = vmatpush3.xpose.msra.mxu1 %v6126_v30 }
 0x3b2   :  { %5487 = vmatprep.mubr.msk.f32.mxu0 %vm5744_vm1, %v5743_v40  ;;  %5495 = vmatprep.subr.mxu0 %v5743_v40 }
 0x3b3   :  { %5512 = vmatprep.mubr.msk.f32.mxu1 %vm5744_vm1, %v5743_v40  ;;  %5520 = vmatprep.subr.mxu1 %v5743_v40 }
 0x3b4   :  { %5488 = vmatmul.mubr.f32.vlgmr.msra.gmra.mxu0 %v2633_v6  ;;  %5513 = vmatmul.mubr.f32.vlgmr.msra.gmra.mxu1 %v6150_v49 }
 0x3b5   :  { %5496 = vmatpush3.xpose.msra.mxu0 %v6135_v37  ;;  %5521 = vmatpush3.xpose.msra.mxu1 %v3128_v8 }
 0x3b6   :  { %5497 = vmatprep.mubr.msk.f32.mxu0 %vm5744_vm1, %v5743_v40  ;;  %5505 = vmatprep.subr.mxu0 %v5743_v40 }
 0x3b7   :  { %5522 = vmatprep.mubr.msk.f32.mxu1 %vm5744_vm1, %v5743_v40  ;;  %5530 = vmatprep.subr.mxu1 %v5743_v40 }
 0x3b8   :  { %5498 = vmatmul.mubr.f32.vlgmr.msra.gmra.mxu0 %v2630_v55  ;;  %5523 = vmatmul.mubr.f32.vlgmr.msra.gmra.mxu1 %v3083_v1 }
 0x3b9   :  { %5506 = vmatpush3.xpose.msra.mxu0 %v2672_v43  ;;  %5531 = vmatpush3.xpose.msra.mxu1 %v6158_v52 }
 0x3ba   :  { %5507 = vmatprep.mubr.msk.f32.mxu0 %vm5744_vm1, %v5743_v40  ;;  %5515 = vmatprep.subr.mxu0 %v5743_v40 }
 0x3bb   :  { %5532 = vmatprep.mubr.msk.f32.mxu1 %vm5744_vm1, %v5743_v40  ;;  %5540 = vmatprep.subr.mxu1 %v5743_v40 }
 0x3bc   :  { %5508 = vmatmul.mubr.f32.vlgmr.msra.gmra.mxu0 %v6150_v49  ;;  %5533 = vmatmul.mubr.f32.vlgmr.msra.gmra.mxu1 %v3085_v12 }
 0x3bd   :  { %5516 = vmatpush3.xpose.msra.mxu0 %v6158_v52  ;;  %5541 = vmatpush3.xpose.msra.mxu1 %v6158_v52 }
 0x3be   :  { %5517 = vmatprep.mubr.msk.f32.mxu0 %vm5744_vm1, %v5743_v40  ;;  %5525 = vmatprep.subr.mxu0 %v5743_v40 }
 0x3bf   :  { %5542 = vmatprep.mubr.msk.f32.mxu1 %vm5744_vm1, %v5743_v40  ;;  %5550 = vmatprep.subr.mxu1 %v5743_v40 }
 0x3c0   :  { %5518 = vmatmul.mubr.f32.vlgmr.msra.gmra.mxu0 %v3087_v14  ;;  %5543 = vmatmul.mubr.f32.vlgmr.msra.gmra.mxu1 %v3083_v1 }
 0x3c1   :  { %5526 = vmatpush3.xpose.msra.mxu0 %v6168_v59  ;;  %5527 = vmatprep.mubr.msk.f32.mxu0 %vm5744_vm1, %v5743_v40 }
 0x3c2   :  { %5535 = vmatprep.subr.mxu0 %v5743_v40  ;;  %5552 = vmatprep.mubr.msk.f32.mxu1 %vm5744_vm1, %v5743_v40 }
 0x3c4   :  { %5528 = vmatmul.mubr.f32.vlgmr.msra.gmra.mxu0 %v3084_v7 }
 0x3c5   :  { %5536 = vmatpush3.xpose.msra.mxu0 %v3126_v62  ;;  %5537 = vmatprep.mubr.msk.f32.mxu0 %vm5744_vm1, %v5743_v40 }
 0x3c6   :  { %5545 = vmatprep.subr.mxu0 %v5743_v40 }
 0x3c8   :  { %5538 = vmatmul.mubr.f32.vlgmr.msra.gmra.mxu0 %v3083_v1 }
 0x3c9   :  { %5547 = vmatprep.mubr.msk.f32.mxu0 %vm5744_vm1, %v5743_v40 }
 0x454   :  { %v1808_v15 = vpop.f32.mrf.mxu1 }
 0x456   :  { %v5434_v16 = vpop.f32.mrf.mxu1 }
 0x458   :  { %v1956_v18 = vpop.f32.mrf.mxu1 }
 0x45a   :  { %v5444_v3 = vpop.f32.mrf.mxu1 }
 0x45c   :  { %v1732_v4 = vpop.f32.mrf.mxu0  ;;  %v2102_v5 = vpop.f32.mrf.mxu1 }
 0x45d   :  { %v1809_v9 = vadd.f32 %v1808_v15, %v1732_v4 }
 0x45e   :  { %v5429_v10 = vpop.f32.mrf.mxu0  ;;  %v5454_v11 = vpop.f32.mrf.mxu1 }
 0x460   :  { %v1882_v19 = vpop.f32.mrf.mxu0  ;;  %v2257_v21 = vpop.f32.mrf.mxu1 }
 0x461   :  { %v1883_v22 = vadd.f32 %v1882_v19, %v1809_v9 }
 0x462   :  { %v5439_v17 = vpop.f32.mrf.mxu0  ;;  %v5464_v23 = vpop.f32.mrf.mxu1 }
 0x463   :  { %v1957_v24 = vadd.f32 %v1956_v18, %v1883_v22 }
 0x464   :  { %v2030_v25 = vpop.f32.mrf.mxu0  ;;  %v2405_v20 = vpop.f32.mrf.mxu1 }
 0x465   :  { %v2031_v26 = vadd.f32 %v2030_v25, %v1957_v24 }
 0x466   :  { %v5449_v27 = vpop.f32.mrf.mxu0  ;;  %v5474_v28 = vpop.f32.mrf.mxu1 }
 0x467   :  { %v6238_v29 = vadd.f32 %v2102_v5, %v2031_v26 }
 0x468   :  { %v2181_v30 = vpop.f32.mrf.mxu0  ;;  %v2551_v31 = vpop.f32.mrf.mxu1 }
 0x469   :  { %v2258_v32 = vadd.f32 %v2257_v21, %v2181_v30 }
 0x46a   :  { %v5459_v33 = vpop.f32.mrf.mxu0  ;;  %v5484_v34 = vpop.f32.mrf.mxu1 }
 0x46c   :  { %v2331_v35 = vpop.f32.mrf.mxu0  ;;  %v2711_v36 = vpop.f32.mrf.mxu1 }
 0x46d   :  { %v2332_v37 = vadd.f32 %v2331_v35, %v2258_v32 }
 0x46e   :  { %v5469_v38 = vpop.f32.mrf.mxu0  ;;  %v5494_v39 = vpop.f32.mrf.mxu1 }
 0x46f   :  { %v2406_v41 = vadd.f32 %v2405_v20, %v2332_v37 }
 0x470   :  { %v2479_v42 = vpop.f32.mrf.mxu0  ;;  %v2859_v43 = vpop.f32.mrf.mxu1 }
 0x471   :  { %v2480_v45 = vadd.f32 %v2479_v42, %v2406_v41 }
 0x472   :  { %v5479_v46 = vpop.f32.mrf.mxu0  ;;  %v5504_v47 = vpop.f32.mrf.mxu1 }
 0x473   :  { %v6240_v49 = vadd.f32 %v2551_v31, %v2480_v45 }
 0x474   :  { %v2635_v50 = vpop.f32.mrf.mxu0  ;;  %v3005_v51 = vpop.f32.mrf.mxu1 }
 0x475   :  { %v2712_v55 = vadd.f32 %v2711_v36, %v2635_v50 }
 0x476   :  { %v5489_v52 = vpop.f32.mrf.mxu0  ;;  %v5514_v53 = vpop.f32.mrf.mxu1 }
 0x478   :  { %v2785_v57 = vpop.f32.mrf.mxu0  ;;  %v3165_v58 = vpop.f32.mrf.mxu1 }
 0x479   :  { %v2786_v59 = vadd.f32 %v2785_v57, %v2712_v55 }
 0x47a   :  { %v5499_v60 = vpop.f32.mrf.mxu0  ;;  %v5524_v61 = vpop.f32.mrf.mxu1 }
 0x47b   :  { %v2860_v62 = vadd.f32 %v2859_v43, %v2786_v59 }
 0x47c   :  { %v2933_v63 = vpop.f32.mrf.mxu0  ;;  %v3313_v0 = vpop.f32.mrf.mxu1 }
 0x47d   :  { %v2934_v1 = vadd.f32 %v2933_v63, %v2860_v62 }
 0x47e   :  { %v5509_v2 = vpop.f32.mrf.mxu0  ;;  %v5534_v6 = vpop.f32.mrf.mxu1 }
 0x47f   :  { %v3006_v7 = vadd.f32 %v3005_v51, %v2934_v1  ;;  %v30_v6 = vld [vmem:[%s6489_s1 + $0x78] sm:$0xff] }
 0x480   :  { %v3089_v8 = vpop.f32.mrf.mxu0  ;;  %v3459_v12 = vpop.f32.mrf.mxu1 }
 0x481   :  { %v3463_v13 = vsel %vm1620_vm3, %v3006_v7, -inf  ;;  %v3166_v16 = vadd.f32 %v3165_v58, %v3089_v8 }
 0x482   :  { %v5544_v14 = vpop.f32.mrf.mxu1  ;;  %3464 = vmax.xlane.f32.xlu1 %v3463_v13  ;;  %v5519_v15 = vpop.f32.mrf.mxu0 }
 0x483   :  { %v29_v14 = vld [vmem:[%s6489_s1 + $0x70] sm:$0xff] }
 0x484   :  { %v3239_v18 = vpop.f32.mrf.mxu0  ;;  %v6304_v15 = vand.u32 4294901760, %v29_v14 }
 0x485   :  { %v3240_v3 = vadd.f32 %v3239_v18, %v3166_v16  ;;  %v28_v16 = vld [vmem:[%s6489_s1 + $0x68] sm:$0xff] }
 0x486   :  { %v5529_v4 = vpop.f32.mrf.mxu0  ;;  %v6310_v18 = vsub.f32 %v29_v14, %v6304_v15 }
 0x487   :  { %v3314_v5 = vadd.f32 %v3313_v0, %v3240_v3  ;;  %v6312_v3 = vand.u32 4294901760, %v28_v16  ;;  %v27_v4 = vld [vmem:[%s6489_s1 + $0x60] sm:$0xff] }
 0x488   :  { %v3387_v9 = vpop.f32.mrf.mxu0 }
 0x489   :  { %v3388_v10 = vadd.f32 %v3387_v9, %v3314_v5  ;;  %v6320_v5 = vand.u32 4294901760, %v6310_v18  ;;  %v6323_v9 = vsub.f32 %v28_v16, %v6312_v3 }
 0x48a   :  { %v5539_v11 = vpop.f32.mrf.mxu0 }
 0x48b   :  { %v3460_v19 = vadd.f32 %v3459_v12, %v3388_v10  ;;  %v6325_v10 = vand.u32 4294901760, %v27_v4  ;;  %v26_v11 = vld [vmem:[%s6489_s1 + $0x58] sm:$0xff] }
 0x48d   :  { %v3466_v21 = vsel %vm1620_vm3, %v3460_v19, -inf }
 0x48e   :  { %3467 = vmax.xlane.f32.xlu0 %v3466_v21  ;;  %v6335_v21 = vand.u32 4294901760, %v6323_v9 }
 0x50b   :  { %v3465_v22 = vpop.xlane.xlu1 %3464 }
 0x50c   :  { %v3469_v17 = vsub.f32 %v3006_v7, %v3465_v22  ;;  %v6289_v7 = vand.u32 4294901760, %v30_v6  ;;  %v6338_v22 = vsub.f32 %v27_v4, %v6325_v10 }
 0x50e   :  { %v3471_v23 = vmul.f32 1.442695, %v3469_v17  ;;  %v6292_v8 = vsub.f32 %v30_v6, %v6289_v7  ;;  %v6340_v17 = vand.u32 4294901760, %v26_v11 }
 0x510   :  { %5735 = vpow2.f32 %v3471_v23  ;;  %v6297_v12 = vand.u32 4294901760, %v6292_v8 }
 0x517   :  { %v3468_v24 = vpop.xlane.xlu0 %3467 }
 0x518   :  { %v3470_v25 = vsub.f32 %v3460_v19, %v3468_v24  ;;  %v4538_v19 = vsub.f32 %v6310_v18, %v6320_v5  ;;  %v25_v24 = vld [vmem:[%s6489_s1 + $0x50] sm:$0xff] }
 0x51a   :  { %v3473_v20 = vmul.f32 1.442695, %v3470_v25 }
 0x51c   :  { %5737 = vpow2.f32 %v3473_v20  ;;  %v4539_v20 = vand.u32 4294901760, %v4538_v19 }
 0x51d   :  { %v5736_v26 = vpop.eup %5735 }
 0x51e   :  { %v3475_v27 = vsel %vm1620_vm3, %v5736_v26, 0.0 }
 0x51f   :  { %3476 = vadd.xlane.f32.xlu1 %v3475_v27  ;;  %v6350_v27 = vand.u32 4294901760, %v6338_v22 }
 0x529   :  { %v5738_v28 = vpop.eup %5737 }
 0x52a   :  { %v3478_v30 = vsel %vm1620_vm3, %v5738_v28, 0.0 }
 0x52b   :  { %3479 = vadd.xlane.f32.xlu0 %v3478_v30 }
 0x530   :  { %3485 = vrot.lane.b32.xlu1 %v6036_v54, %s5749_s8 }
 0x534   :  { %3487 = vrot.lane.b32.xlu1 %v6039_v56, %s5749_s8 }
 0x538   :  { %3493 = vrot.lane.b32.xlu1 %v6028_v44, %s5746_s5 }
 0x541   :  { %3491 = vrot.lane.b32.xlu0 %v6034_v48, %s5746_s5 }
 0x5a8   :  { %v3477_v31 = vpop.xlane.xlu1 %3476 }
 0x5a9   :  { %5739 = vrcp.f32 %v3477_v31 }
 0x5ac   :  { %v3486_v32 = vpop.permute.xlu1 %3485 }
 0x5b0   :  { %v3488_v33 = vpop.permute.xlu1 %3487 }
 0x5b4   :  { %v3480_v34 = vpop.xlane.xlu0 %3479  ;;  %v3494_v37 = vpop.permute.xlu1 %3493 }
 0x5b5   :  { %5741 = vrcp.f32 %v3480_v34  ;;  %v3498_v39 = vsel %vm714_vm2, %v3488_v33, %v3494_v37  ;;  %v24_v33 = vld [vmem:[%s6489_s1 + $0x48] sm:$0xff] }
 0x5b6   :  { %v5740_v35 = vpop.eup %5739  ;;  %v3982_v43 = vand.u32 4294901760, %v3498_v39 }
 0x5b7   :  { %v3482_v36 = vmul.f32 %v5740_v35, %v5736_v26  ;;  %v4545_v26 = vsub.f32 %v6323_v9, %v6335_v21 }
 0x5b8   :  { %v3492_v38 = vpop.permute.xlu0 %3491  ;;  %v4059_v51 = vsub.f32 %v3498_v39, %v3982_v43  ;;  %v23_v39 = vld [vmem:[%s6489_s1 + $0x40] sm:$0xff] }
 0x5b9   :  { %v3497_v54 = vsel %vm714_vm2, %v3486_v32, %v3492_v38  ;;  %v3500_v56 = vsel %vm1620_vm3, %v3482_v36, 0  ;;  %v6356_v32 = vand.u32 4294901760, %v25_v24  ;;  %v4546_v35 = vand.u32 4294901760, %v4545_v26 }
 0x5ba   :  { %v3533_v44 = vand.u32 4294901760, %v3497_v54  ;;  %v3568_v41 = vand.u32 4294901760, %v3500_v56  ;;  %v4060_v58 = vand.u32 4294901760, %v4059_v51  ;;  %v4552_v36 = vsub.f32 %v6338_v22, %v6350_v27 }
 0x5bb   :  { %v6367_v38 = vand.u32 4294901760, %v24_v33 }
 0x5bc   :  { %v3610_v42 = vsub.f32 %v3497_v54, %v3533_v44  ;;  %5546 = vmatpush3.msra.mxu0 %v3533_v44  ;;  %v3569_v48 = vsub.f32 %v3500_v56, %v3568_v41  ;;  %v4061_v62 = vsub.f32 %v4059_v51, %v4060_v58  ;;  %v6370_v56 = vsub.f32 %v25_v24, %v6356_v32 }
 0x5bd   :  { %5555 = vmatprep.subr.mxu0 %v5743_v40 }
 0x5be   :  { %v3611_v45 = vand.u32 4294901760, %v3610_v42  ;;  %v3570_v46 = vand.u32 4294901760, %v3569_v48  ;;  %v4062_v1 = vand.u32 4294901760, %v4061_v62 }
 0x5c0   :  { %v3612_v47 = vsub.f32 %v3610_v42, %v3611_v45  ;;  %v3571_v50 = vsub.f32 %v3569_v48, %v3570_v46 }
 0x5c2   :  { %v5742_v52 = vpop.eup %5741  ;;  %v3572_v53 = vand.u32 4294901760, %v3571_v50  ;;  %v3613_v55 = vand.u32 4294901760, %v3612_v47  ;;  %v6385_v47 = vand.u32 4294901760, %v23_v39 }
 0x5c3   :  { %v3484_v57 = vmul.f32 %v5742_v52, %v5738_v28  ;;  %v6353_v28 = vsub.f32 %v26_v11, %v6340_v17 }
 0x5c4   :  { %5548 = vmatmul.mubr.f32.vlgmr.msra.gmra.mxu0 %v3572_v53  ;;  %5551 = vmatpush3.msra.mxu1 %v3613_v55 }
 0x5c5   :  { %5556 = vmatpush3.msra.mxu0 %v3610_v42  ;;  %5553 = vmatmul.mubr.f32.vlgmr.msra.gmra.mxu1 %v3568_v41  ;;  %v3949_v59 = vsel %vm1620_vm3, %v3484_v57, 0  ;;  %v6365_v37 = vand.u32 4294901760, %v6353_v28 }
 0x5c6   :  { %5560 = vmatprep.subr.mxu1 %v5743_v40  ;;  %5557 = vmatprep.mubr.msk.f32.mxu0 %vm5744_vm1, %v5743_v40  ;;  %v4017_v60 = vand.u32 4294901760, %v3949_v59 }
 0x5c7   :  { %5561 = vmatpush3.msra.mxu1 %v3533_v44  ;;  %5565 = vmatprep.subr.mxu0 %v5743_v40  ;;  %v4559_v42 = vsub.f32 %v6353_v28, %v6365_v37 }
 0x5c8   :  { %5558 = vmatmul.mubr.f32.vlgmr.msra.gmra.mxu0 %v3569_v48  ;;  %5562 = vmatprep.mubr.msk.f32.mxu1 %vm5744_vm1, %v5743_v40  ;;  %v4018_v61 = vsub.f32 %v3949_v59, %v4017_v60  ;;  %v6379_v48 = vsub.f32 %v24_v33, %v6367_v38 }
 0x5c9   :  { %5566 = vmatpush3.msra.mxu0 %v3611_v45  ;;  %5570 = vmatprep.subr.mxu1 %v5743_v40 }
 0x5ca   :  { %5563 = vmatmul.mubr.f32.vlgmr.msra.gmra.mxu1 %v3570_v46  ;;  %5567 = vmatprep.mubr.msk.f32.mxu0 %vm5744_vm1, %v5743_v40  ;;  %v4019_v63 = vand.u32 4294901760, %v4018_v61  ;;  %v6383_v46 = vand.u32 4294901760, %v6370_v56  ;;  %v6389_v52 = vand.u32 4294901760, %v6379_v48 }
 0x5cb   :  { %5571 = vmatpush3.msra.mxu1 %v3533_v44  ;;  %5575 = vmatprep.subr.mxu0 %v5743_v40 }
 0x5cc   :  { %5568 = vmatmul.mubr.f32.vlgmr.msra.gmra.mxu0 %v3568_v41  ;;  %5572 = vmatprep.mubr.msk.f32.mxu1 %vm5744_vm1, %v5743_v40  ;;  %v4020_v0 = vsub.f32 %v4018_v61, %v4019_v63  ;;  %v4566_v57 = vsub.f32 %v6370_v56, %v6383_v46 }
 0x5cd   :  { %5576 = vmatpush3.msra.mxu0 %v3982_v43  ;;  %5580 = vmatprep.subr.mxu1 %v5743_v40 }
 0x5ce   :  { %5573 = vmatmul.mubr.f32.vlgmr.msra.gmra.mxu1 %v3568_v41  ;;  %5577 = vmatprep.mubr.msk.f32.mxu0 %vm5744_vm1, %v5743_v40  ;;  %v4021_v2 = vand.u32 4294901760, %v4020_v0  ;;  %v4553_v41 = vand.u32 4294901760, %v4552_v36 }
 0x5cf   :  { %5581 = vmatpush3.msra.mxu1 %v4062_v1  ;;  %5585 = vmatprep.subr.mxu0 %v5743_v40 }
 0x5d0   :  { %5578 = vmatmul.mubr.f32.vlgmr.msra.gmra.mxu0 %v4021_v2  ;;  %5582 = vmatprep.mubr.msk.f32.mxu1 %vm5744_vm1, %v5743_v40 }
 0x5d1   :  { %5586 = vmatpush3.msra.mxu0 %v4059_v51  ;;  %5590 = vmatprep.subr.mxu1 %v5743_v40  ;;  %v4560_v51 = vand.u32 4294901760, %v4559_v42 }
 0x5d2   :  { %5583 = vmatmul.mubr.f32.vlgmr.msra.gmra.mxu1 %v4017_v60  ;;  %5587 = vmatprep.mubr.msk.f32.mxu0 %vm5744_vm1, %v5743_v40 }
 0x5d3   :  { %5591 = vmatpush3.msra.mxu1 %v3982_v43  ;;  %5595 = vmatprep.subr.mxu0 %v5743_v40 }
 0x5d4   :  { %5588 = vmatmul.mubr.f32.vlgmr.msra.gmra.mxu0 %v4018_v61  ;;  %5592 = vmatprep.mubr.msk.f32.mxu1 %vm5744_vm1, %v5743_v40 }
 0x5d5   :  { %5596 = vmatpush3.msra.mxu0 %v4060_v58  ;;  %5600 = vmatprep.subr.mxu1 %v5743_v40  ;;  %v6395_v58 = vsub.f32 %v23_v39, %v6385_v47 }
 0x5d6   :  { %5593 = vmatmul.mubr.f32.vlgmr.msra.gmra.mxu1 %v4019_v63  ;;  %5597 = vmatprep.mubr.msk.f32.mxu0 %vm5744_vm1, %v5743_v40  ;;  %v4567_v63 = vand.u32 4294901760, %v4566_v57 }
 0x5d7   :  { %5601 = vmatpush3.msra.mxu1 %v3982_v43  ;;  %5602 = vmatprep.mubr.msk.f32.mxu1 %vm5744_vm1, %v5743_v40  ;;  %v4531_v40 = vsub.f32 %v6292_v8, %v6297_v12  ;;  %v6402_v0 = vand.u32 4294901760, %v6395_v58 }
 0x5d8   :  { %5598 = vmatmul.mubr.f32.vlgmr.msra.gmra.mxu0 %v4017_v60  ;;  %5605 = vmatprep.subr.mxu0 %v6289_v7 }
 0x5d9   :  { %5606 = vmatpush3.msra.mxu0 %v6289_v7  ;;  %v4532_v13 = vand.u32 4294901760, %v4531_v40 }
 0x5da   :  { %5603 = vmatmul.mubr.f32.vlgmr.msra.gmra.mxu1 %v4017_v60  ;;  %5607 = vmatprep.subr.mxu0 %v6304_v15  ;;  %v4573_v60 = vsub.f32 %v6379_v48, %v6389_v52 }
 0x5db   :  { %5624 = vmatprep.subr.mxu1 %v4532_v13  ;;  %5608 = vmatpush3.msra.mxu0 %v6304_v15 }
 0x5dc   :  { %5625 = vmatpush3.msra.mxu1 %v4532_v13  ;;  %5609 = vmatprep.subr.mxu0 %v6312_v3  ;;  %v4574_v2 = vand.u32 4294901760, %v4573_v60  ;;  %v4580_v13 = vsub.f32 %v6395_v58, %v6402_v0 }
 0x5dd   :  { %5610 = vmatpush3.msra.mxu0 %v6312_v3  ;;  %5626 = vmatprep.subr.mxu1 %v4539_v20 }
 0x5de   :  { %5611 = vmatprep.subr.mxu0 %v6325_v10  ;;  %5627 = vmatpush3.msra.mxu1 %v4539_v20  ;;  %v4581_v4 = vand.u32 4294901760, %v4580_v13 }
 0x5df   :  { %5612 = vmatpush3.msra.mxu0 %v6325_v10  ;;  %5628 = vmatprep.subr.mxu1 %v4546_v35 }
 0x5e0   :  { %5613 = vmatprep.subr.mxu0 %v6340_v17  ;;  %5629 = vmatpush3.msra.mxu1 %v4546_v35 }
 0x5e1   :  { %5614 = vmatpush3.msra.mxu0 %v6340_v17  ;;  %5630 = vmatprep.subr.mxu1 %v4553_v41 }
 0x5e2   :  { %5615 = vmatprep.subr.mxu0 %v6356_v32  ;;  %5631 = vmatpush3.msra.mxu1 %v4553_v41 }
 0x5e3   :  { %5616 = vmatpush3.msra.mxu0 %v6356_v32  ;;  %5632 = vmatprep.subr.mxu1 %v4560_v51 }
 0x5e4   :  { %5617 = vmatprep.subr.mxu0 %v6367_v38  ;;  %5633 = vmatpush3.msra.mxu1 %v4560_v51 }
 0x5e5   :  { %5618 = vmatpush3.msra.mxu0 %v6367_v38  ;;  %5634 = vmatprep.subr.mxu1 %v4567_v63 }
 0x5e6   :  { %5619 = vmatprep.subr.mxu0 %v6385_v47  ;;  %5635 = vmatpush3.msra.mxu1 %v4567_v63 }
 0x5e7   :  { %5620 = vmatpush3.msra.mxu0 %v6385_v47  ;;  %5636 = vmatprep.subr.mxu1 %v4574_v2 }
 0x5e8   :  { %5643 = vmatprep.subr.mxu0 %v6292_v8  ;;  %5637 = vmatpush3.msra.mxu1 %v4574_v2 }
 0x5e9   :  { %5638 = vmatprep.subr.mxu1 %v4581_v4 }
 0x5ea   :  { %5639 = vmatpush3.msra.mxu1 %v4581_v4 }
 0x5eb   :  { %5662 = vmatprep.subr.mxu1 %v6289_v7 }
 0x684   :  { %v3574_v23 = vpop.f32.mrf.mxu0 }
 0x685   :  { %v3650_v25 = vpop.f32.mrf.mxu1 }
 0x686   :  { %v3651_v30 = vadd.f32 %v3650_v25, %v3574_v23  ;;  %v5549_v31 = vpop.f32.mrf.mxu0 }
 0x687   :  { %v5554_v34 = vpop.f32.mrf.mxu1 }
 0x688   :  { %v3724_v54 = vpop.f32.mrf.mxu0 }
 0x689   :  { %v3725_v44 = vadd.f32 %v3724_v54, %v3651_v30 }
 0x68a   :  { %v3798_v43 = vpop.f32.mrf.mxu1  ;;  %v5559_v45 = vpop.f32.mrf.mxu0 }
 0x68b   :  { %v3799_v50 = vadd.f32 %v3798_v43, %v3725_v44 }
 0x68c   :  { %v5564_v53 = vpop.f32.mrf.mxu1  ;;  %v3872_v55 = vpop.f32.mrf.mxu0 }
 0x68d   :  { %v3873_v59 = vadd.f32 %v3872_v55, %v3799_v50 }
 0x68e   :  { %v3944_v61 = vpop.f32.mrf.mxu1  ;;  %v5569_v62 = vpop.f32.mrf.mxu0 }
 0x68f   :  { %v3945_v1 = vadd.f32 %v3944_v61, %v3873_v59 }
 0x690   :  { %v5574_v6 = vpop.f32.mrf.mxu1  ;;  %v4023_v40 = vpop.f32.mrf.mxu0 }
 0x691   :  { %4399 = vrot.lane.b32.xlu0 %v3945_v1, %s5750_s25 }
 0x692   :  { %v4099_v14 = vpop.f32.mrf.mxu1  ;;  %v5579_v16 = vpop.f32.mrf.mxu0 }
 0x693   :  { %v4100_v11 = vadd.f32 %v4099_v14, %v4023_v40 }
 0x694   :  { %v5584_v19 = vpop.f32.mrf.mxu1  ;;  %v4173_v23 = vpop.f32.mrf.mxu0 }
 0x695   :  { %v4174_v24 = vadd.f32 %v4173_v23, %v4100_v11 }
 0x696   :  { %v4247_v25 = vpop.f32.mrf.mxu1  ;;  %v5589_v20 = vpop.f32.mrf.mxu0 }
 0x697   :  { %v4248_v26 = vadd.f32 %v4247_v25, %v4174_v24 }
 0x698   :  { %v5594_v30 = vpop.f32.mrf.mxu1  ;;  %v4321_v31 = vpop.f32.mrf.mxu0 }
 0x699   :  { %v4322_v33 = vadd.f32 %v4321_v31, %v4248_v26 }
 0x69a   :  { %v4393_v34 = vpop.f32.mrf.mxu1  ;;  %v5599_v35 = vpop.f32.mrf.mxu0 }
 0x69b   :  { %v4394_v36 = vadd.f32 %v4393_v34, %v4322_v33 }
 0x69c   :  { %v5604_v54 = vpop.f32.mrf.mxu1 }
 0x69d   :  { %4401 = vrot.lane.b32.xlu1 %v4394_v36, %s5750_s25 }
 0x703   :  { %v4400_v39 = vpop.permute.xlu0 %4399 }
 0x704   :  { %v4406_v44 = vsel %vm4405_vm4, %v6238_v29, %v4400_v39 }
 0x705   :  { %v4413_v41 = vsel %vm32_vm0, %v4406_v44, 0 }
 0x706   :  { %v4491_v42 = vand.u32 4294901760, %v4413_v41 }
 0x708   :  { %v4492_v43 = vsub.f32 %v4413_v41, %v4491_v42  ;;  %5640 = vmatprep.mubr.f32.mxu1 %v4491_v42 }
 0x70a   :  { %v4493_v45 = vand.u32 4294901760, %v4492_v43 }
 0x70c   :  { %v4494_v50 = vsub.f32 %v4492_v43, %v4493_v45 }
 0x70e   :  { %v4495_v51 = vand.u32 4294901760, %v4494_v50 }
 0x70f   :  { %v4402_v53 = vpop.permute.xlu1 %4401 }
 0x710   :  { %v4407_v55 = vsel %vm4405_vm4, %v6240_v49, %v4402_v53  ;;  %5621 = vmatprep.mubr.f32.mxu0 %v4495_v51 }
 0x711   :  { %v4416_v57 = vsel %vm32_vm0, %v4407_v55, 0 }
 0x712   :  { %v6412_v59 = vand.u32 4294901760, %v4416_v57 }
 0x714   :  { %v4502_v60 = vsub.f32 %v4416_v57, %v6412_v59  ;;  %5641 = vmatmul.mubr.f32.vlgmr.msra.gmra.mxu1 %v6412_v59 }
 0x715   :  { %5663 = vmatpush3.msra.mxu1 %v6289_v7  ;;  %5678 = vmatprep.mubr.f32.mxu1 %v4493_v45 }
 0x716   :  { %v4503_v29 = vand.u32 4294901760, %v4502_v60  ;;  %5664 = vmatprep.subr.mxu1 %v6304_v15 }
 0x717   :  { %5665 = vmatpush3.msra.mxu1 %v6304_v15 }
 0x718   :  { %5666 = vmatprep.subr.mxu1 %v6312_v3  ;;  %v4504_v49 = vsub.f32 %v4502_v60, %v4503_v29 }
 0x719   :  { %5667 = vmatpush3.msra.mxu1 %v6312_v3 }
 0x71a   :  { %5668 = vmatprep.subr.mxu1 %v6325_v10  ;;  %v4505_v61 = vand.u32 4294901760, %v4504_v49 }
 0x71b   :  { %5669 = vmatpush3.msra.mxu1 %v6325_v10 }
 0x71c   :  { %5670 = vmatprep.subr.mxu1 %v6340_v17  ;;  %5622 = vmatmul.mubr.f32.vlgmr.msra.gmra.mxu0 %v4505_v61 }
 0x71d   :  { %5644 = vmatpush3.msra.mxu0 %v6292_v8  ;;  %5671 = vmatpush3.msra.mxu1 %v6340_v17  ;;  %v5004_v8 = vld [vmem:[%s6489_s1 + $0x80] ss:$0 sm:$0xff] }
 0x71e   :  { %5645 = vmatprep.subr.mxu0 %v6310_v18  ;;  %5659 = vmatprep.mubr.f32.mxu0 %v4492_v43 }
 0x71f   :  { %5672 = vmatprep.subr.mxu1 %v6356_v32  ;;  %5646 = vmatpush3.msra.mxu0 %v6310_v18 }
 0x720   :  { %5673 = vmatpush3.msra.mxu1 %v6356_v32  ;;  %5647 = vmatprep.subr.mxu0 %v6323_v9 }
 0x721   :  { %5674 = vmatprep.subr.mxu1 %v6367_v38  ;;  %5648 = vmatpush3.msra.mxu0 %v6323_v9 }
 0x722   :  { %5675 = vmatpush3.msra.mxu1 %v6367_v38  ;;  %5649 = vmatprep.subr.mxu0 %v6338_v22 }
 0x723   :  { %5676 = vmatprep.subr.mxu1 %v6385_v47  ;;  %5650 = vmatpush3.msra.mxu0 %v6338_v22 }
 0x724   :  { %5677 = vmatpush3.msra.mxu1 %v6385_v47  ;;  %5651 = vmatprep.subr.mxu0 %v6353_v28 }
 0x725   :  { %5679 = vmatmul.mubr.f32.vlgmr.msra.gmra.mxu1 %v4503_v29  ;;  %5700 = vmatprep.subr.mxu1 %v6289_v7 }
 0x726   :  { %5652 = vmatpush3.msra.mxu0 %v6353_v28  ;;  %5701 = vmatpush3.msra.mxu1 %v6289_v7 }
 0x727   :  { %5716 = vmatprep.mubr.f32.mxu1 %v4491_v42  ;;  %5653 = vmatprep.subr.mxu0 %v6370_v56 }
 0x728   :  { %5702 = vmatprep.subr.mxu1 %v6304_v15  ;;  %5654 = vmatpush3.msra.mxu0 %v6370_v56 }
 0x729   :  { %5703 = vmatpush3.msra.mxu1 %v6304_v15  ;;  %5655 = vmatprep.subr.mxu0 %v6379_v48 }
 0x72a   :  { %5704 = vmatprep.subr.mxu1 %v6312_v3  ;;  %5656 = vmatpush3.msra.mxu0 %v6379_v48 }
 0x72b   :  { %5705 = vmatpush3.msra.mxu1 %v6312_v3  ;;  %5657 = vmatprep.subr.mxu0 %v6395_v58 }
 0x72c   :  { %5706 = vmatprep.subr.mxu1 %v6325_v10  ;;  %5658 = vmatpush3.msra.mxu0 %v6395_v58 }
 0x72d   :  { %5707 = vmatpush3.msra.mxu1 %v6325_v10  ;;  %5660 = vmatmul.mubr.f32.vlgmr.msra.gmra.mxu0 %v4502_v60 }
 0x72e   :  { %5681 = vmatprep.subr.mxu0 %v6297_v12  ;;  %5708 = vmatprep.subr.mxu1 %v6340_v17 }
 0x72f   :  { %5682 = vmatpush3.msra.mxu0 %v6297_v12  ;;  %5697 = vmatprep.mubr.f32.mxu0 %v4491_v42 }
 0x730   :  { %5709 = vmatpush3.msra.mxu1 %v6340_v17  ;;  %5683 = vmatprep.subr.mxu0 %v6320_v5 }
 0x731   :  { %5710 = vmatprep.subr.mxu1 %v6356_v32  ;;  %5684 = vmatpush3.msra.mxu0 %v6320_v5 }
 0x732   :  { %5711 = vmatpush3.msra.mxu1 %v6356_v32  ;;  %5685 = vmatprep.subr.mxu0 %v6335_v21 }
 0x733   :  { %5712 = vmatprep.subr.mxu1 %v6367_v38  ;;  %5686 = vmatpush3.msra.mxu0 %v6335_v21 }
 0x734   :  { %5713 = vmatpush3.msra.mxu1 %v6367_v38  ;;  %5687 = vmatprep.subr.mxu0 %v6350_v27 }
 0x735   :  { %5714 = vmatprep.subr.mxu1 %v6385_v47  ;;  %5688 = vmatpush3.msra.mxu0 %v6350_v27 }
 0x736   :  { %5715 = vmatpush3.msra.mxu1 %v6385_v47  ;;  %5689 = vmatprep.subr.mxu0 %v6365_v37 }
 0x737   :  { %5717 = vmatmul.mubr.f32.vlgmr.msra.gmra.mxu1 %v6412_v59  ;;  %5690 = vmatpush3.msra.mxu0 %v6365_v37 }
 0x738   :  { %5691 = vmatprep.subr.mxu0 %v6383_v46 }
 0x739   :  { %5692 = vmatpush3.msra.mxu0 %v6383_v46 }
 0x73a   :  { %5693 = vmatprep.subr.mxu0 %v6389_v52 }
 0x73b   :  { %5694 = vmatpush3.msra.mxu0 %v6389_v52 }
 0x73c   :  { %5695 = vmatprep.subr.mxu0 %v6402_v0 }
 0x73d   :  { %5696 = vmatpush3.msra.mxu0 %v6402_v0 }
 0x73e   :  { %5698 = vmatmul.mubr.f32.vlgmr.msra.gmra.mxu0 %v6412_v59 }
 0x7d4   :  { %v5642_v12 = vpop.f32.mrf.mxu1 }
 0x7d6   :  { %v4618_v9 = vpop.f32.mrf.mxu1 }
 0x7dc   :  { %v5623_v7 = vpop.f32.mrf.mxu0 }
 0x7dd   :  { %v4508_v18 = vadd.f32 %v5623_v7, %v5004_v8 }
 0x7de   :  { %v4497_v15 = vpop.f32.mrf.mxu0 }
 0x7df   :  { %v4498_v5 = vadd.f32 %v5004_v8, %v4497_v15  ;;  %v4625_v10 = vadd.f32 %v5642_v12, %v4508_v18 }
 0x7e1   :  { %v4619_v27 = vadd.f32 %v4618_v9, %v4498_v5 }
 0x7e5   :  { %v5680_v21 = vpop.f32.mrf.mxu1 }
 0x7e7   :  { %v4800_v32 = vpop.f32.mrf.mxu1 }
 0x7ed   :  { %v5661_v3 = vpop.f32.mrf.mxu0 }
 0x7ee   :  { %v4720_v17 = vadd.f32 %v5661_v3, %v4625_v10 }
 0x7ef   :  { %v4712_v22 = vpop.f32.mrf.mxu0 }
 0x7f0   :  { %v4713_v28 = vadd.f32 %v4712_v22, %v4619_v27  ;;  %v4809_v37 = vadd.f32 %v5680_v21, %v4720_v17 }
 0x7f2   :  { %v4801_v46 = vadd.f32 %v4800_v32, %v4713_v28 }
 0x7f7   :  { %v5718_v38 = vpop.f32.mrf.mxu1 }
 0x7f9   :  { %v4988_v62 = vpop.f32.mrf.mxu1 }
 0x7fe   :  { %v5699_v56 = vpop.f32.mrf.mxu0 }
 0x7ff   :  { %v4910_v48 = vadd.f32 %v5699_v56, %v4809_v37 }
 0x800   :  { %v4903_v47 = vpop.f32.mrf.mxu0 }
 0x801   :  { %v4995_v52 = vadd.f32 %v5718_v38, %v4910_v48  ;;  %v4904_v58 = vadd.f32 %v4903_v47, %v4801_v46 }
 0x803   :  { %4999 = vst [vmem:[%s6491_s2 + $0x8] sm:$0xff] %v4995_v52  ;;  %v4989_v63 = vadd.f32 %v4988_v62, %v4904_v58 }
 0x805   :  { %4998 = vst [vmem:[%s6491_s2] sm:$0xff] %v4989_v63 }

</bundles_post_ra>
